<compile_context>
chip_gen: v7x
topology: tpu7x:2x2x1
jax: 0.10.0
libtpu: 0.0.40
codegen_flags: <defaults>
</compile_context>

<pallas_src>
import jax
import jax.numpy as jnp
import numpy as np
from jax.experimental import pallas as pl

C = 3      # RGB (Normalize([0.485, 0.456, 0.406], ...) implies 3-channel images)
H = 16
W = 16
FEAT = H * W * C          # 768 = 6 * 128  -> lane-dense


# ------------------------------ fused kernel --------------------------------
def _combine_kernel(z_ref, wg_ref, bg_ref, mc_ref, bc_ref, gen_ref, out_ref):
    # generator: Linear(latent_dim -> H*W*C) + tanh, then generated_images.clamp_(0,1)
    g = jnp.dot(z_ref[...], wg_ref[...], preferred_element_type=jnp.float32)
    g = jnp.clip(jnp.tanh(g + bg_ref[...]), 0.0, 1.0)            # (B, H*W*C)
    gen_ref[...] = g
    # exact_model: 3x3 SAME conv expressed as a banded dense matmul, + bias + sigmoid
    y = jnp.dot(g, mc_ref[...], preferred_element_type=jnp.float32)
    out_ref[...] = jax.nn.sigmoid(y + bc_ref[...])               # (B, H*W*Cout)


def combine_pallas(latents, wg, bg, mc, bc_full):
    bsz, lat = latents.shape
    feat = wg.shape[1]            # H*W*C
    feat_out = mc.shape[1]        # H*W*Cout
    gen_flat, out_flat = pl.pallas_call(
        _combine_kernel,
        out_shape=(jax.ShapeDtypeStruct((bsz, feat), jnp.float32),
                   jax.ShapeDtypeStruct((bsz, feat_out), jnp.float32)),
        grid=(1,),
        in_specs=[
            pl.BlockSpec((bsz, lat), lambda i: (0, 0)),
            pl.BlockSpec((lat, feat), lambda i: (0, 0)),
            pl.BlockSpec((1, feat), lambda i: (0, 0)),
            pl.BlockSpec((feat, feat_out), lambda i: (0, 0)),
            pl.BlockSpec((1, feat_out), lambda i: (0, 0)),
        ],
        out_specs=(
            pl.BlockSpec((bsz, feat), lambda i: (0, 0)),
            pl.BlockSpec((bsz, feat_out), lambda i: (0, 0)),
        ),
    )(latents, wg, bg, mc, bc_full)
    cout = feat_out // (H * W)
    return (gen_flat.reshape(bsz, H, W, C),
            out_flat.reshape(bsz, H, W, cout))


# --------------------------- parameter preparation ---------------------------
def conv3x3_same_as_matrix(wc):
    """Exact reformulation of a stride-1 SAME 3x3 conv (HWIO weights) as a banded
    (H*W*Cin, H*W*Cout) matrix acting on row-major NHWC-flattened images.
    Host-side, run once per set of conv weights (weight preprocessing)."""
    wc = np.asarray(wc, dtype=np.float32)
    kh, kw, cin, cout = wc.shape
    m = np.zeros((H * W * cin, H * W * cout), dtype=np.float32)
    for ky in range(kh):
        for kx in range(kw):
            for ho in range(H):
                hi = ho + ky - 1
                if hi < 0 or hi >= H:
                    continue
                for wo in range(W):
                    wi = wo + kx - 1
                    if wi < 0 or wi >= W:
                        continue
                    r = (hi * W + wi) * cin
                    c = (ho * W + wo) * cout
                    m[r:r + cin, c:c + cout] += wc[ky, kx]
    return jnp.asarray(m)


# ------------------------------ combined model ------------------------------
def combine_forward(key, batch_size, latent_dim, params):
    # latents = torch.randn(batch_size, latent_dim)
    latents = jax.random.normal(key, (batch_size, latent_dim), dtype=jnp.float32)
    generated_images, output = combine_pallas(
        latents, params["Wg"], params["bg"], params["Mc"], params["bc_full"])

    # label = np.uint8(output[0] * 255).transpose(1, 2, 0)        (already HWC here)
    label = (output[0] * 255.0).astype(jnp.uint8)
    # image233 = np.uint8(generated_images[0] * 255).transpose(1, 2, 0)
    image233 = (generated_images[0] * 255.0).astype(jnp.uint8)
    # TODO(synk): cv2.resize(1024x1024), cv2.cvtColor(BGR2RGB), matplotlib display
    # and the intentional `assert 0 == 1` are host-side visualization / crash with
    # no Pallas equivalent.
    return generated_images, output, image233, label


if __name__ == "__main__":
    batch_size, latent_dim = 2, 32

    key = jax.random.PRNGKey(0)
    kz, kg, kgb, kc, kcb = jax.random.split(key, 5)

    # Deterministic synthetic parameters (shapes implied by the forward pass).
    Wg = jax.random.normal(kg, (latent_dim, FEAT), jnp.float32) * 0.05
    bg = jax.random.normal(kgb, (1, FEAT), jnp.float32) * 0.01
    Wc = jax.random.normal(kc, (3, 3, C, C), jnp.float32) * 0.10      # HWIO
    bc = jax.random.normal(kcb, (1, C), jnp.float32) * 0.01

    params = {
        "Wg": Wg,
        "bg": bg,
        "Mc": conv3x3_same_as_matrix(Wc),          # (768, 768) banded conv matrix
        "bc_full": jnp.tile(bc, (1, H * W)),       # (1, 768) bias, (h,w,co) order
    }

    gen, out, image233, label = combine_forward(kz, batch_size, latent_dim, params)
    jax.block_until_ready((gen, out, image233, label))

    # Pure-JAX reference check (uses the ORIGINAL conv weights, so it also
    # validates that the banded-matrix reformulation is exact).
    latents = jax.random.normal(kz, (batch_size, latent_dim), dtype=jnp.float32)
    ref_gen = jnp.clip(jnp.tanh(latents @ Wg + bg), 0.0, 1.0).reshape(batch_size, H, W, C)
    ref_out = jax.nn.sigmoid(
        jax.lax.conv_general_dilated(
            ref_gen, Wc, window_strides=(1, 1), padding="SAME",
            dimension_numbers=("NHWC", "HWIO", "NHWC")) + bc.reshape(1, 1, 1, C))

    assert gen.shape == (batch_size, H, W, C) and out.shape == (batch_size, H, W, C)
    assert label.shape == (H, W, C) and label.dtype == jnp.uint8
    assert image233.shape == (H, W, C) and image233.dtype == jnp.uint8
    np.testing.assert_allclose(np.asarray(gen), np.asarray(ref_gen), atol=1e-4, rtol=1e-4)
    np.testing.assert_allclose(np.asarray(out), np.asarray(ref_out), atol=1e-4, rtol=1e-4)

    print("KERNEL_OK")
</pallas_src>

<mosaic_0001>
module attributes {stable_mosaic.version = 11 : i64} {
  func.func @_combine_kernel(%arg0: i32, %arg1: memref<2x32xf32, #tpu.memory_space<vmem>>, %arg2: memref<32x768xf32, #tpu.memory_space<vmem>>, %arg3: memref<1x768xf32, #tpu.memory_space<vmem>>, %arg4: memref<768x768xf32, #tpu.memory_space<vmem>>, %arg5: memref<1x768xf32, #tpu.memory_space<vmem>>, %arg6: memref<2x768xf32, #tpu.memory_space<vmem>>, %arg7: memref<2x768xf32, #tpu.memory_space<vmem>>) attributes {dimension_semantics = [#tpu.dimension_semantics<arbitrary>], iteration_bounds = array<i64: 1>, scalar_prefetch = 0 : i64, scratch_operands = 0 : i64, tpu.core_type = #tpu.core_type<tc>, window_params = [{pipeline_mode = #tpu.pipeline_mode<synchronous>, transform_indices = @transform_0, window_bounds = array<i64: 2, 32>}, {pipeline_mode = #tpu.pipeline_mode<synchronous>, transform_indices = @transform_1, window_bounds = array<i64: 32, 768>}, {pipeline_mode = #tpu.pipeline_mode<synchronous>, transform_indices = @transform_2, window_bounds = array<i64: 1, 768>}, {pipeline_mode = #tpu.pipeline_mode<synchronous>, transform_indices = @transform_3, window_bounds = array<i64: 768, 768>}, {pipeline_mode = #tpu.pipeline_mode<synchronous>, transform_indices = @transform_4, window_bounds = array<i64: 1, 768>}, {pipeline_mode = #tpu.pipeline_mode<synchronous>, transform_indices = @transform_5, window_bounds = array<i64: 2, 768>}, {pipeline_mode = #tpu.pipeline_mode<synchronous>, transform_indices = @transform_6, window_bounds = array<i64: 2, 768>}]} {
    %c0 = arith.constant 0 : index
    %c0_0 = arith.constant 0 : index
    %0 = vector.load %arg1[%c0, %c0_0] : memref<2x32xf32, #tpu.memory_space<vmem>>, vector<2x32xf32>
    %c0_1 = arith.constant 0 : index
    %c0_2 = arith.constant 0 : index
    %1 = vector.load %arg2[%c0_1, %c0_2] : memref<32x768xf32, #tpu.memory_space<vmem>>, vector<32x768xf32>
    %cst = arith.constant dense<0.000000e+00> : vector<2x768xf32>
    %2 = tpu.matmul %0, %1, %cst {dimension_numbers = #tpu.dot_dimension_numbers<[1], [0], [0], [1], [0, 0, 1, 1], [], []>} : vector<2x32xf32>, vector<32x768xf32>, vector<2x768xf32> -> vector<2x768xf32>
    %c0_3 = arith.constant 0 : index
    %c0_4 = arith.constant 0 : index
    %3 = vector.load %arg3[%c0_3, %c0_4] : memref<1x768xf32, #tpu.memory_space<vmem>>, vector<1x768xf32>
    %4 = vector.broadcast %3 : vector<1x768xf32> to vector<2x768xf32>
    %5 = arith.addf %2, %4 : vector<2x768xf32>
    %6 = math.tanh %5 : vector<2x768xf32>
    %cst_5 = arith.constant 0.000000e+00 : f32
    %cst_6 = arith.constant 1.000000e+00 : f32
    %7 = vector.broadcast %cst_5 : f32 to vector<2x768xf32>
    %8 = arith.maximumf %7, %6 : vector<2x768xf32>
    %9 = vector.broadcast %cst_6 : f32 to vector<2x768xf32>
    %10 = arith.minimumf %9, %8 : vector<2x768xf32>
    %c0_7 = arith.constant 0 : index
    %c0_8 = arith.constant 0 : index
    %11 = vector.load %arg6[%c0_7, %c0_8] : memref<2x768xf32, #tpu.memory_space<vmem>>, vector<2x768xf32>
    tpu.vector_store %arg6[%c0_7, %c0_8], %10 {strides = array<i32>} : memref<2x768xf32, #tpu.memory_space<vmem>>, vector<2x768xf32>,
    %c0_9 = arith.constant 0 : index
    %c0_10 = arith.constant 0 : index
    %12 = vector.load %arg4[%c0_9, %c0_10] : memref<768x768xf32, #tpu.memory_space<vmem>>, vector<768x768xf32>
    %cst_11 = arith.constant dense<0.000000e+00> : vector<2x768xf32>
    %13 = tpu.matmul %10, %12, %cst_11 {dimension_numbers = #tpu.dot_dimension_numbers<[1], [0], [0], [1], [0, 0, 1, 1], [], []>} : vector<2x768xf32>, vector<768x768xf32>, vector<2x768xf32> -> vector<2x768xf32>
    %c0_12 = arith.constant 0 : index
    %c0_13 = arith.constant 0 : index
    %14 = vector.load %arg5[%c0_12, %c0_13] : memref<1x768xf32, #tpu.memory_space<vmem>>, vector<1x768xf32>
    %15 = vector.broadcast %14 : vector<1x768xf32> to vector<2x768xf32>
    %16 = arith.addf %13, %15 : vector<2x768xf32>
    %17 = arith.negf %16 : vector<2x768xf32>
    %18 = math.exp %17 : vector<2x768xf32>
    %cst_14 = arith.constant 1.000000e+00 : f32
    %19 = vector.broadcast %cst_14 : f32 to vector<2x768xf32>
    %20 = arith.addf %19, %18 : vector<2x768xf32>
    %21 = arith.divf %19, %20 : vector<2x768xf32>
    %c0_15 = arith.constant 0 : index
    %c0_16 = arith.constant 0 : index
    %22 = vector.load %arg7[%c0_15, %c0_16] : memref<2x768xf32, #tpu.memory_space<vmem>>, vector<2x768xf32>
    tpu.vector_store %arg7[%c0_15, %c0_16], %21 {strides = array<i32>} : memref<2x768xf32, #tpu.memory_space<vmem>>, vector<2x768xf32>,
    return
  }
  func.func @transform_0(%arg0: i32) -> (i32, i32) {
    %c0_i32 = arith.constant 0 : i32
    %c0_i32_0 = arith.constant 0 : i32
    %c0_i32_1 = arith.constant 0 : i32
    return %c0_i32, %c0_i32_0 : i32, i32
  }
  func.func @transform_1(%arg0: i32) -> (i32, i32) {
    %c0_i32 = arith.constant 0 : i32
    %c0_i32_0 = arith.constant 0 : i32
    %c0_i32_1 = arith.constant 0 : i32
    return %c0_i32, %c0_i32_0 : i32, i32
  }
  func.func @transform_2(%arg0: i32) -> (i32, i32) {
    %c0_i32 = arith.constant 0 : i32
    %c0_i32_0 = arith.constant 0 : i32
    %c0_i32_1 = arith.constant 0 : i32
    return %c0_i32, %c0_i32_0 : i32, i32
  }
  func.func @transform_3(%arg0: i32) -> (i32, i32) {
    %c0_i32 = arith.constant 0 : i32
    %c0_i32_0 = arith.constant 0 : i32
    %c0_i32_1 = arith.constant 0 : i32
    return %c0_i32, %c0_i32_0 : i32, i32
  }
  func.func @transform_4(%arg0: i32) -> (i32, i32) {
    %c0_i32 = arith.constant 0 : i32
    %c0_i32_0 = arith.constant 0 : i32
    %c0_i32_1 = arith.constant 0 : i32
    return %c0_i32, %c0_i32_0 : i32, i32
  }
  func.func @transform_5(%arg0: i32) -> (i32, i32) {
    %c0_i32 = arith.constant 0 : i32
    %c0_i32_0 = arith.constant 0 : i32
    %c0_i32_1 = arith.constant 0 : i32
    return %c0_i32, %c0_i32_0 : i32, i32
  }
  func.func @transform_6(%arg0: i32) -> (i32, i32) {
    %c0_i32 = arith.constant 0 : i32
    %c0_i32_0 = arith.constant 0 : i32
    %c0_i32_1 = arith.constant 0 : i32
    return %c0_i32, %c0_i32_0 : i32, i32
  }
}

</mosaic_0001>

<bundles_post_ra>
// kernel: tpu_custom_call.1
= control target key start
LH: loop header
LB: loop body
LE: loop exit
PB: predicated region body
PF: predicated region fallthrough
CT: control target
= control target key end

     0   :  { %12 = vsyncpa [#allocation3], 0  ;;  %s2824_s0 = inlined_call_operand.hbm [shape: f32[2,32], index: 0, kind: input, shape index: {}]   ;;  %s2825_s1 = inlined_call_operand.hbm [shape: f32[32,768], index: 1, kind: input, shape index: {}]   ;;  %s2826_s2 = inlined_call_operand.hbm [shape: f32[1,768], index: 2, kind: input, shape index: {}]   ;;  %s2827_s3 = inlined_call_operand.hbm [shape: f32[768,768], index: 3, kind: input, shape index: {}]   ;;  %s2828_s4 = inlined_call_operand.hbm [shape: f32[1,768], index: 4, kind: input, shape index: {}]   ;;  %s2829_s5 = inlined_call_operand.hbm [shape: f32[2,768], index: 5, kind: output, shape index: {0}]   ;;  %s2830_s6 = inlined_call_operand.hbm [shape: f32[2,768], index: 6, kind: output, shape index: {1}]  }
   0x1   :  { %13 = vsyncpa [#allocation6], 0 }
   0x2   :  { %14 = vsyncpa [#allocation9], 0 }
   0x3   :  { %15 = vsyncpa [#allocation4], 0 }
   0x4   :  { %16 = vsyncpa [#allocation13], 0  ;;  %s2602_s21 = smov [#allocation5]   ;;  %s2438_s25 = scalar_lea.hbm %s2825_s1, 3072 }
   0x5   :  { %s32_s22 = sshll.u32 %s2602_s21, 4  ;;  %p2439_p0 = scmp.ne.s32.totalorder %s2825_s1, %s2438_s25  ;;  %s33_s22 = int_to_ptr.vmem [resolvable:$true] %s32_s22 }
   0x6   :  { %p2442_p1 = scmp.lt.u32.totalorder %s2438_s25, %s2825_s1 }
   0x8   :  { %p2444_p2 = pnand %p2442_p1, %p2439_p0 }
   0xa   :  { %2447 = shalt.err (!%p2444_p2)
}
   0xb   :  { %s2448_s30 = scalar_lea.vmem %s33_s22, 3072  ;;  %p2453_p4 = scmp.lt.s32.totalorder %s33_s22, %s33_s22 }
   0xc   :  { %p2449_p3 = scmp.ne.s32.totalorder %s33_s22, %s2448_s30  ;;  %p2454_p5 = scmp.lt.s32.totalorder %s2448_s30, %s2448_s30 }
   0xe   :  { %p2455_p6 = por %p2454_p5, %p2453_p4 }
  0x10   :  { %p2456_p7 = pnand %p2455_p6, %p2449_p3 }
  0x12   :  { %2459 = shalt.err (!%p2456_p7)
}
  0x13   :  { %s2603_s7 = smov 768   ;;  %s2604_s8 = smov 48  }
  0x14   :  { %38 = dma.hbm_to_vmem [thread:$0]  %s2825_s1, 3072, %s33_s22, [#allocation6], %s2603_s7, %s2603_s7, %s2604_s8  }
  0x15   :  { %s2605_s11 = smov [#allocation8]   ;;  %s2606_s13 = smov [#allocation2]  }
  0x16   :  { %s54_s12 = sshll.u32 %s2605_s11, 4  ;;  %s23_s14 = sshll.u32 %s2606_s13, 4  ;;  %s55_s12 = int_to_ptr.vmem [resolvable:$true] %s54_s12  ;;  %s24_s14 = int_to_ptr.vmem [resolvable:$true] %s23_s14 }
  0x17   :  { %s2460_s17 = scalar_lea.hbm %s2827_s3, 73728 }
  0x18   :  { %p2461_p8 = scmp.ne.s32.totalorder %s2827_s3, %s2460_s17  ;;  %p2464_p9 = scmp.lt.u32.totalorder %s2460_s17, %s2827_s3 }
  0x1a   :  { %p2466_p10 = pnand %p2464_p9, %p2461_p8 }
  0x1c   :  { %2469 = shalt.err (!%p2466_p10)
}
  0x1d   :  { %s2470_s1 = scalar_lea.vmem %s55_s12, 73728  ;;  %p2475_p12 = scmp.lt.s32.totalorder %s55_s12, %s55_s12 }
  0x1e   :  { %p2471_p11 = scmp.ne.s32.totalorder %s55_s12, %s2470_s1  ;;  %p2476_p13 = scmp.lt.s32.totalorder %s2470_s1, %s2470_s1 }
  0x20   :  { %p2477_p0 = por %p2476_p13, %p2475_p12 }
  0x22   :  { %p2478_p1 = pnand %p2477_p0, %p2471_p11 }
  0x24   :  { %2481 = shalt.err (!%p2478_p1)
}
  0x25   :  { %60 = dma.hbm_to_vmem [thread:$0]  %s2827_s3, 73728, %s55_s12, [#allocation9], %s2603_s7, %s2603_s7, %s2604_s8  }
  0x26   :  { %s2482_s26 = scalar_lea.hbm %s2824_s0, 32 }
  0x27   :  { %p2483_p2 = scmp.ne.s32.totalorder %s2824_s0, %s2482_s26  ;;  %p2486_p3 = scmp.lt.u32.totalorder %s2482_s26, %s2824_s0 }
  0x29   :  { %p2488_p4 = pnand %p2486_p3, %p2483_p2 }
  0x2b   :  { %2491 = shalt.err (!%p2488_p4)
}
  0x2c   :  { %s2492_s9 = scalar_lea.vmem %s24_s14, 32  ;;  %p2497_p6 = scmp.lt.s32.totalorder %s24_s14, %s24_s14 }
  0x2d   :  { %p2493_p5 = scmp.ne.s32.totalorder %s24_s14, %s2492_s9  ;;  %p2498_p7 = scmp.lt.s32.totalorder %s2492_s9, %s2492_s9 }
  0x2f   :  { %p2499_p8 = por %p2498_p7, %p2497_p6 }
  0x31   :  { %p2500_p9 = pnand %p2499_p8, %p2493_p5 }
  0x33   :  { %2503 = shalt.err (!%p2500_p9)
}
  0x34   :  { %26 = dma.hbm_to_vmem [thread:$0]  %s2824_s0, 32, %s24_s14, [#allocation3]  }
  0x35   :  { %s2607_s8 = smov [#allocation7]   ;;  %s2608_s11 = smov [#allocation10]  }
  0x36   :  { %s45_s10 = sshll.u32 %s2607_s8, 4  ;;  %s67_s12 = sshll.u32 %s2608_s11, 4  ;;  %s46_s10 = int_to_ptr.vmem [resolvable:$true] %s45_s10  ;;  %s68_s12 = int_to_ptr.vmem [resolvable:$true] %s67_s12 }
  0x37   :  { %s2504_s16 = scalar_lea.hbm %s2826_s2, 96 }
  0x38   :  { %p2505_p10 = scmp.ne.s32.totalorder %s2826_s2, %s2504_s16  ;;  %p2508_p11 = scmp.lt.u32.totalorder %s2504_s16, %s2826_s2 }
  0x3a   :  { %p2510_p12 = pnand %p2508_p11, %p2505_p10 }
  0x3c   :  { %2513 = shalt.err (!%p2510_p12)
}
  0x3d   :  { %s2514_s0 = scalar_lea.vmem %s46_s10, 96  ;;  %p2519_p0 = scmp.lt.s32.totalorder %s46_s10, %s46_s10 }
  0x3e   :  { %p2515_p13 = scmp.ne.s32.totalorder %s46_s10, %s2514_s0  ;;  %p2520_p1 = scmp.lt.s32.totalorder %s2514_s0, %s2514_s0 }
  0x40   :  { %p2521_p2 = por %p2520_p1, %p2519_p0 }
  0x42   :  { %p2522_p3 = pnand %p2521_p2, %p2515_p13 }
  0x44   :  { %2525 = shalt.err (!%p2522_p3)
}
  0x45   :  { %48 = dma.hbm_to_vmem [thread:$0]  %s2826_s2, 96, %s46_s10, [#allocation6]  }
  0x46   :  { %s2526_s23 = scalar_lea.hbm %s2828_s4, 96 }
  0x47   :  { %p2527_p4 = scmp.ne.s32.totalorder %s2828_s4, %s2526_s23  ;;  %p2530_p5 = scmp.lt.u32.totalorder %s2526_s23, %s2828_s4 }
  0x49   :  { %p2532_p6 = pnand %p2530_p5, %p2527_p4 }
  0x4b   :  { %2535 = shalt.err (!%p2532_p6)
}
  0x4c   :  { %s2536_s28 = scalar_lea.vmem %s68_s12, 96  ;;  %p2541_p8 = scmp.lt.s32.totalorder %s68_s12, %s68_s12 }
  0x4d   :  { %p2537_p7 = scmp.ne.s32.totalorder %s68_s12, %s2536_s28  ;;  %p2542_p9 = scmp.lt.s32.totalorder %s2536_s28, %s2536_s28 }
  0x4f   :  { %p2543_p10 = por %p2542_p9, %p2541_p8 }
  0x51   :  { %p2544_p11 = pnand %p2543_p10, %p2537_p7 }
  0x53   :  { %2547 = shalt.err (!%p2544_p11)
}
  0x54   :  { %70 = dma.hbm_to_vmem [thread:$0]  %s2828_s4, 96, %s68_s12, [#allocation9]  }
  0x55   :  { %2592 = dma.done.wait [#allocation3], 32  }
  0x56   :  { %2593 = vsyncadd [#allocation3], 4294967264 }
  0x57   :  { %2594 = dma.done.wait [#allocation6], 3168  }
  0x58   :  { %2595 = vsyncadd [#allocation6], 4294964128 }
  0x59   :  { %2596 = dma.done.wait [#allocation9], 73824  }
  0x5a   :  { %2597 = vsyncadd [#allocation9], 4294893472  ;;  %v2609_v0 = vmov 0.0   ;;  %v88_v1 = vld [vmem:[#allocation5 + $0x8] sm:$0xff]  ;;  %v94_v2 = vld [vmem:[#allocation5 + $0x38] sm:$0xff]  ;;  %vm143_vm0 = vcmask 261120  }
  0x5b   :  { %211 = vmatprep.mubr.f32.mxu0 %v2609_v0  ;;  %v87_v3 = vld [vmem:[#allocation5] sm:$0xff]  ;;  %v1773_v4 = vpack.c.bf16 %v94_v2, %v88_v1  ;;  %v93_v5 = vld [vmem:[#allocation5 + $0x30] sm:$0xff]  ;;  %v100_v6 = vld [vmem:[#allocation5 + $0x68] sm:$0xff]  ;;  %s2611_s4 = smov [#allocation11]  }
  0x5c   :  { %v106_v7 = vld [vmem:[#allocation5 + $0x98] sm:$0xff]  ;;  %v1775_v8 = vpack.c.bf16 %v93_v5, %v87_v3  ;;  %v99_v10 = vld [vmem:[#allocation5 + $0x60] sm:$0xff]  ;;  %v105_v11 = vld [vmem:[#allocation5 + $0x90] sm:$0xff]  ;;  %s1737_s30 = sshll.u32 %s2611_s4, 4  ;;  %s1738_s30 = int_to_ptr.vmem [resolvable:$true] %s1737_s30 }
  0x5d   :  { %v1777_v9 = vpack.c.bf16 %v106_v7, %v100_v6  ;;  %1774 = vmatprep.subr.bf16.mxu0 %v1773_v4  ;;  %v90_v12 = vld [vmem:[#allocation5 + $0x18] sm:$0xff]  ;;  %v96_v13 = vld [vmem:[#allocation5 + $0x48] sm:$0xff]  ;;  %v1779_v14 = vpack.c.bf16 %v105_v11, %v99_v10  ;;  %v89_v16 = vld [vmem:[#allocation5 + $0x10] sm:$0xff]  ;;  %s2548_s9 = scalar_lea.vmem %s1738_s30, 192  ;;  %p2553_p13 = scmp.lt.s32.totalorder %s1738_s30, %s1738_s30 }
  0x5e   :  { %1776 = vmatpush1.bf16.msra.mxu0 %v1775_v8  ;;  %v1781_v15 = vpack.c.bf16 %v96_v13, %v90_v12  ;;  %v95_v17 = vld [vmem:[#allocation5 + $0x40] sm:$0xff]  ;;  %v102_v18 = vld [vmem:[#allocation5 + $0x78] sm:$0xff]  ;;  %v108_v19 = vld [vmem:[#allocation5 + $0xa8] sm:$0xff]  ;;  %p2549_p12 = scmp.ne.s32.totalorder %s1738_s30, %s2548_s9  ;;  %p2554_p0 = scmp.lt.s32.totalorder %s2548_s9, %s2548_s9 }
  0x5f   :  { %1778 = vmatprep.subr.bf16.mxu0 %v1777_v9  ;;  %v2709_v20 = vld [vmem:[#allocation2] sm:$0x3]  ;;  %v1783_v21 = vpack.c.bf16 %v95_v17, %v89_v16  ;;  %v1785_v22 = vpack.c.bf16 %v108_v19, %v102_v18  ;;  %v101_v23 = vld [vmem:[#allocation5 + $0x70] sm:$0xff]  ;;  %v107_v24 = vld [vmem:[#allocation5 + $0xa0] sm:$0xff] }
  0x60   :  { %v92_v25 = vld [vmem:[#allocation5 + $0x28] sm:$0xff]  ;;  %v98_v26 = vld [vmem:[#allocation5 + $0x58] sm:$0xff]  ;;  %v1787_v28 = vpack.c.bf16 %v107_v24, %v101_v23  ;;  %v91_v29 = vld [vmem:[#allocation5 + $0x20] sm:$0xff]  ;;  %p2555_p1 = por %p2554_p0, %p2553_p13 }
  0x61   :  { %v606_v27 = vld [vmem:[#allocation8 + $0x608] sm:$0xff]  ;;  %v612_v31 = vld [vmem:[#allocation8 + $0x638] sm:$0xff]  ;;  %v1789_v32 = vpack.c.bf16 %v98_v26, %v92_v25  ;;  %v605_v35 = vld [vmem:[#allocation8 + $0x600] sm:$0xff] }
  0x62   :  { %1780 = vmatpush1.bf16.msra.mxu0 %v1779_v14  ;;  %v97_v30 = vld [vmem:[#allocation5 + $0x50] sm:$0xff]  ;;  %v104_v33 = vld [vmem:[#allocation5 + $0x88] sm:$0xff]  ;;  %v1861_v34 = vpack.c.bf16 %v612_v31, %v606_v27  ;;  %v110_v37 = vld [vmem:[#allocation5 + $0xb8] sm:$0xff]  ;;  %p2556_p2 = pnand %p2555_p1, %p2549_p12 }
  0x63   :  { %1782 = vmatprep.subr.bf16.mxu0 %v1781_v15  ;;  %v611_v36 = vld [vmem:[#allocation8 + $0x630] sm:$0xff]  ;;  %v618_v39 = vld [vmem:[#allocation8 + $0x668] sm:$0xff]  ;;  %v624_v40 = vld [vmem:[#allocation8 + $0x698] sm:$0xff]  ;;  %v1791_v43 = vpack.c.bf16 %v97_v30, %v91_v29  ;;  %v1793_v47 = vpack.c.bf16 %v110_v37, %v104_v33 }
  0x64   :  { %v1863_v38 = vpack.c.bf16 %v611_v36, %v605_v35  ;;  %1862 = vmatprep.subr.bf16.mxu1 %v1861_v34  ;;  %v1865_v41 = vpack.c.bf16 %v624_v40, %v618_v39  ;;  %v617_v42 = vld [vmem:[#allocation8 + $0x660] sm:$0xff]  ;;  %v109_v45 = vld [vmem:[#allocation5 + $0xb0] sm:$0xff]  ;;  %v636_v51 = vld [vmem:[#allocation8 + $0x6f8] sm:$0xff] }
  0x65   :  { %1762 = vmatmul.mubr.msk.f32.vlgmr.msra.gmra.mrb[0].mxu0 %vm143_vm0, %v2709_v20  ;;  %v103_v44 = vld [vmem:[#allocation5 + $0x80] sm:$0xff]  ;;  %v623_v46 = vld [vmem:[#allocation8 + $0x690] sm:$0xff]  ;;  %v414_v48 = vld [vmem:[#allocation8 + $0x8] sm:$0xff] }
  0x66   :  { %1784 = vmatpush1.bf16.msra.mxu0 %v1783_v21  ;;  %282 = vmatprep.mubr.f32.mxu0 %v2609_v0  ;;  %v1867_v49 = vpack.c.bf16 %v623_v46, %v617_v42  ;;  %v630_v50 = vld [vmem:[#allocation8 + $0x6c8] sm:$0xff]  ;;  %v420_v52 = vld [vmem:[#allocation8 + $0x38] sm:$0xff]  ;;  %v629_v54 = vld [vmem:[#allocation8 + $0x6c0] sm:$0xff]  ;;  %v1795_v57 = vpack.c.bf16 %v109_v45, %v103_v44 }
  0x67   :  { %1786 = vmatprep.subr.bf16.mxu0 %v1785_v22  ;;  %1864 = vmatpush1.bf16.msra.mxu1 %v1863_v38  ;;  %v1869_v53 = vpack.c.bf16 %v636_v51, %v630_v50  ;;  %v635_v55 = vld [vmem:[#allocation8 + $0x6f0] sm:$0xff]  ;;  %v642_v56 = vld [vmem:[#allocation8 + $0x728] sm:$0xff]  ;;  %v648_v58 = vld [vmem:[#allocation8 + $0x758] sm:$0xff]  ;;  %v1797_v59 = vpack.c.bf16 %v420_v52, %v414_v48 }
  0x68   :  { %1866 = vmatprep.subr.bf16.mxu1 %v1865_v41  ;;  %v413_v60 = vld [vmem:[#allocation8] sm:$0xff]  ;;  %v419_v61 = vld [vmem:[#allocation8 + $0x30] sm:$0xff]  ;;  %v426_v62 = vld [vmem:[#allocation8 + $0x68] sm:$0xff]  ;;  %v1871_v63 = vpack.c.bf16 %v635_v55, %v629_v54  ;;  %v1873_v2 = vpack.c.bf16 %v648_v58, %v642_v56 }
  0x69   :  { %v432_v1 = vld [vmem:[#allocation8 + $0x98] sm:$0xff]  ;;  %v641_v3 = vld [vmem:[#allocation8 + $0x720] sm:$0xff]  ;;  %v647_v4 = vld [vmem:[#allocation8 + $0x750] sm:$0xff]  ;;  %v1799_v7 = vpack.c.bf16 %v419_v61, %v413_v60 }
  0x6a   :  { %1788 = vmatpush1.bf16.msra.mxu0 %v1787_v28  ;;  %v654_v5 = vld [vmem:[#allocation8 + $0x788] sm:$0xff]  ;;  %v660_v6 = vld [vmem:[#allocation8 + $0x7b8] sm:$0xff]  ;;  %v1801_v8 = vpack.c.bf16 %v432_v1, %v426_v62  ;;  %v431_v9 = vld [vmem:[#allocation8 + $0x90] sm:$0xff]  ;;  %v1875_v11 = vpack.c.bf16 %v647_v4, %v641_v3 }
  0x6b   :  { %1790 = vmatprep.subr.bf16.mxu0 %v1789_v32  ;;  %1868 = vmatpush1.bf16.msra.mxu1 %v1867_v49  ;;  %v438_v10 = vld [vmem:[#allocation8 + $0xc8] sm:$0xff]  ;;  %v444_v12 = vld [vmem:[#allocation8 + $0xf8] sm:$0xff]  ;;  %v1877_v13 = vpack.c.bf16 %v660_v6, %v654_v5  ;;  %v653_v14 = vld [vmem:[#allocation8 + $0x780] sm:$0xff] }
  0x6c   :  { %1870 = vmatprep.subr.bf16.mxu1 %v1869_v53  ;;  %v659_v15 = vld [vmem:[#allocation8 + $0x7b0] sm:$0xff]  ;;  %v666_v16 = vld [vmem:[#allocation8 + $0x7e8] sm:$0xff]  ;;  %v672_v17 = vld [vmem:[#allocation8 + $0x818] sm:$0xff]  ;;  %v1805_v19 = vpack.c.bf16 %v444_v12, %v438_v10 }
  0x6d   :  { %1763 = vmatmul.mubr.msk.f32.vlgmr.msra.gmra.mrb[2].mxu0 %vm143_vm0, %v2709_v20  ;;  %v437_v21 = vld [vmem:[#allocation8 + $0xc0] sm:$0xff]  ;;  %v443_v22 = vld [vmem:[#allocation8 + $0xf0] sm:$0xff]  ;;  %v450_v23 = vld [vmem:[#allocation8 + $0x128] sm:$0xff]  ;;  %v1879_v24 = vpack.c.bf16 %v659_v15, %v653_v14  ;;  %v1881_v26 = vpack.c.bf16 %v672_v17, %v666_v16 }
  0x6e   :  { %1792 = vmatpush1.bf16.msra.mxu0 %v1791_v43  ;;  %353 = vmatprep.mubr.f32.mxu0 %v2609_v0  ;;  %v425_v0 = vld [vmem:[#allocation8 + $0x60] sm:$0xff]  ;;  %v456_v25 = vld [vmem:[#allocation8 + $0x158] sm:$0xff]  ;;  %v671_v28 = vld [vmem:[#allocation8 + $0x810] sm:$0xff] }
  0x6f   :  { %1794 = vmatprep.subr.bf16.mxu0 %v1793_v47  ;;  %1872 = vmatpush1.bf16.msra.mxu1 %v1871_v63  ;;  %v1803_v18 = vpack.c.bf16 %v431_v9, %v425_v0  ;;  %v665_v27 = vld [vmem:[#allocation8 + $0x7e0] sm:$0xff]  ;;  %v678_v29 = vld [vmem:[#allocation8 + $0x848] sm:$0xff]  ;;  %v684_v30 = vld [vmem:[#allocation8 + $0x878] sm:$0xff]  ;;  %v1809_v31 = vpack.c.bf16 %v456_v25, %v450_v23 }
  0x70   :  { %1874 = vmatprep.subr.bf16.mxu1 %v1873_v2  ;;  %v449_v32 = vld [vmem:[#allocation8 + $0x120] sm:$0xff]  ;;  %v455_v33 = vld [vmem:[#allocation8 + $0x150] sm:$0xff]  ;;  %v462_v34 = vld [vmem:[#allocation8 + $0x188] sm:$0xff]  ;;  %v1883_v35 = vpack.c.bf16 %v671_v28, %v665_v27  ;;  %v1885_v37 = vpack.c.bf16 %v684_v30, %v678_v29 }
  0x71   :  { %v468_v36 = vld [vmem:[#allocation8 + $0x1b8] sm:$0xff]  ;;  %v677_v38 = vld [vmem:[#allocation8 + $0x840] sm:$0xff]  ;;  %v683_v39 = vld [vmem:[#allocation8 + $0x870] sm:$0xff]  ;;  %v1811_v42 = vpack.c.bf16 %v455_v33, %v449_v32 }
  0x72   :  { %1796 = vmatpush1.bf16.msra.mxu0 %v1795_v57  ;;  %v690_v40 = vld [vmem:[#allocation8 + $0x8a8] sm:$0xff]  ;;  %v696_v41 = vld [vmem:[#allocation8 + $0x8d8] sm:$0xff]  ;;  %v1813_v43 = vpack.c.bf16 %v468_v36, %v462_v34  ;;  %v461_v44 = vld [vmem:[#allocation8 + $0x180] sm:$0xff]  ;;  %v1887_v47 = vpack.c.bf16 %v683_v39, %v677_v38 }
  0x73   :  { %1798 = vmatprep.subr.bf16.mxu0 %v1797_v59  ;;  %1876 = vmatpush1.bf16.msra.mxu1 %v1875_v11  ;;  %v467_v45 = vld [vmem:[#allocation8 + $0x1b0] sm:$0xff]  ;;  %v474_v46 = vld [vmem:[#allocation8 + $0x1e8] sm:$0xff]  ;;  %v480_v48 = vld [vmem:[#allocation8 + $0x218] sm:$0xff]  ;;  %v1889_v49 = vpack.c.bf16 %v696_v41, %v690_v40 }
  0x74   :  { %1878 = vmatprep.subr.bf16.mxu1 %v1877_v13  ;;  %v689_v50 = vld [vmem:[#allocation8 + $0x8a0] sm:$0xff]  ;;  %v695_v51 = vld [vmem:[#allocation8 + $0x8d0] sm:$0xff]  ;;  %v702_v52 = vld [vmem:[#allocation8 + $0x908] sm:$0xff]  ;;  %v1815_v54 = vpack.c.bf16 %v467_v45, %v461_v44  ;;  %v1817_v55 = vpack.c.bf16 %v480_v48, %v474_v46 }
  0x75   :  { %1764 = vmatmul.mubr.msk.f32.vlgmr.msra.gmra.mrb[4].mxu0 %vm143_vm0, %v2709_v20  ;;  %v1807_v20 = vpack.c.bf16 %v443_v22, %v437_v21  ;;  %v708_v53 = vld [vmem:[#allocation8 + $0x938] sm:$0xff]  ;;  %v473_v56 = vld [vmem:[#allocation8 + $0x1e0] sm:$0xff]  ;;  %v479_v57 = vld [vmem:[#allocation8 + $0x210] sm:$0xff]  ;;  %v1891_v59 = vpack.c.bf16 %v695_v51, %v689_v50 }
  0x76   :  { %1800 = vmatpush1.bf16.msra.mxu0 %v1799_v7  ;;  %v486_v58 = vld [vmem:[#allocation8 + $0x248] sm:$0xff]  ;;  %v492_v60 = vld [vmem:[#allocation8 + $0x278] sm:$0xff]  ;;  %v1893_v61 = vpack.c.bf16 %v708_v53, %v702_v52  ;;  %v701_v62 = vld [vmem:[#allocation8 + $0x900] sm:$0xff]  ;;  %v1819_v3 = vpack.c.bf16 %v479_v57, %v473_v56 }
  0x77   :  { %1802 = vmatprep.subr.bf16.mxu0 %v1801_v8  ;;  %1880 = vmatpush1.bf16.msra.mxu1 %v1879_v24  ;;  %v707_v63 = vld [vmem:[#allocation8 + $0x930] sm:$0xff]  ;;  %v714_v1 = vld [vmem:[#allocation8 + $0x968] sm:$0xff]  ;;  %v720_v2 = vld [vmem:[#allocation8 + $0x998] sm:$0xff]  ;;  %v1821_v4 = vpack.c.bf16 %v492_v60, %v486_v58 }
  0x78   :  { %1882 = vmatprep.subr.bf16.mxu1 %v1881_v26  ;;  %v485_v5 = vld [vmem:[#allocation8 + $0x240] sm:$0xff]  ;;  %v491_v6 = vld [vmem:[#allocation8 + $0x270] sm:$0xff]  ;;  %v1895_v7 = vpack.c.bf16 %v707_v63, %v701_v62  ;;  %v498_v8 = vld [vmem:[#allocation8 + $0x2a8] sm:$0xff]  ;;  %v1897_v9 = vpack.c.bf16 %v720_v2, %v714_v1 }
  0x79   :  { %v504_v0 = vld [vmem:[#allocation8 + $0x2d8] sm:$0xff]  ;;  %v1823_v10 = vpack.c.bf16 %v491_v6, %v485_v5  ;;  %v497_v12 = vld [vmem:[#allocation8 + $0x2a0] sm:$0xff]  ;;  %v503_v13 = vld [vmem:[#allocation8 + $0x2d0] sm:$0xff] }
  0x7a   :  { %1804 = vmatpush1.bf16.msra.mxu0 %v1803_v18  ;;  %v1825_v11 = vpack.c.bf16 %v504_v0, %v498_v8  ;;  %v510_v14 = vld [vmem:[#allocation8 + $0x308] sm:$0xff]  ;;  %v516_v15 = vld [vmem:[#allocation8 + $0x338] sm:$0xff]  ;;  %v1827_v16 = vpack.c.bf16 %v503_v13, %v497_v12  ;;  %v509_v18 = vld [vmem:[#allocation8 + $0x300] sm:$0xff] }
  0x7b   :  { %1806 = vmatprep.subr.bf16.mxu0 %v1805_v19  ;;  %1884 = vmatpush1.bf16.msra.mxu1 %v1883_v35  ;;  %v1829_v17 = vpack.c.bf16 %v516_v15, %v510_v14  ;;  %v515_v19 = vld [vmem:[#allocation8 + $0x330] sm:$0xff]  ;;  %v522_v21 = vld [vmem:[#allocation8 + $0x368] sm:$0xff]  ;;  %v528_v22 = vld [vmem:[#allocation8 + $0x398] sm:$0xff] }
  0x7c   :  { %1886 = vmatprep.subr.bf16.mxu1 %v1885_v37  ;;  %v1831_v23 = vpack.c.bf16 %v515_v19, %v509_v18  ;;  %v1833_v24 = vpack.c.bf16 %v528_v22, %v522_v21  ;;  %v521_v25 = vld [vmem:[#allocation8 + $0x360] sm:$0xff]  ;;  %v527_v26 = vld [vmem:[#allocation8 + $0x390] sm:$0xff]  ;;  %v534_v27 = vld [vmem:[#allocation8 + $0x3c8] sm:$0xff] }
  0x7d   :  { %v540_v28 = vld [vmem:[#allocation8 + $0x3f8] sm:$0xff]  ;;  %v1835_v29 = vpack.c.bf16 %v527_v26, %v521_v25  ;;  %v546_v32 = vld [vmem:[#allocation8 + $0x428] sm:$0xff]  ;;  %v545_v36 = vld [vmem:[#allocation8 + $0x420] sm:$0xff] }
  0x7e   :  { %1808 = vmatpush1.bf16.msra.mxu0 %v1807_v20  ;;  %v1837_v30 = vpack.c.bf16 %v540_v28, %v534_v27  ;;  %v533_v20 = vld [vmem:[#allocation8 + $0x3c0] sm:$0xff]  ;;  %v552_v33 = vld [vmem:[#allocation8 + $0x458] sm:$0xff]  ;;  %v551_v37 = vld [vmem:[#allocation8 + $0x450] sm:$0xff] }
  0x7f   :  { %1810 = vmatprep.subr.bf16.mxu0 %v1809_v31  ;;  %1888 = vmatpush1.bf16.msra.mxu1 %v1887_v47  ;;  %v539_v31 = vld [vmem:[#allocation8 + $0x3f0] sm:$0xff]  ;;  %v1841_v35 = vpack.c.bf16 %v552_v33, %v546_v32  ;;  %v713_v38 = vld [vmem:[#allocation8 + $0x960] sm:$0xff]  ;;  %v1843_v39 = vpack.c.bf16 %v551_v37, %v545_v36  ;;  %v726_v44 = vld [vmem:[#allocation8 + $0x9c8] sm:$0xff] }
  0x80   :  { %1890 = vmatprep.subr.bf16.mxu1 %v1889_v49  ;;  %v1839_v34 = vpack.c.bf16 %v539_v31, %v533_v20  ;;  %v719_v40 = vld [vmem:[#allocation8 + $0x990] sm:$0xff]  ;;  %v732_v46 = vld [vmem:[#allocation8 + $0x9f8] sm:$0xff]  ;;  %v557_v47 = vld [vmem:[#allocation8 + $0x480] sm:$0xff] }
  0x81   :  { %v1899_v41 = vpack.c.bf16 %v719_v40, %v713_v38  ;;  %v563_v48 = vld [vmem:[#allocation8 + $0x4b0] sm:$0xff]  ;;  %v1901_v49 = vpack.c.bf16 %v732_v46, %v726_v44  ;;  %v725_v51 = vld [vmem:[#allocation8 + $0x9c0] sm:$0xff]  ;;  %v738_v56 = vld [vmem:[#allocation8 + $0xa28] sm:$0xff]  ;;  %v113_v44 = vlaneseq }
  0x82   :  { %1812 = vmatpush1.bf16.msra.mxu0 %v1811_v42  ;;  %v558_v42 = vld [vmem:[#allocation8 + $0x488] sm:$0xff]  ;;  %v1847_v50 = vpack.c.bf16 %v563_v48, %v557_v47  ;;  %v731_v52 = vld [vmem:[#allocation8 + $0x9f0] sm:$0xff]  ;;  %v744_v58 = vld [vmem:[#allocation8 + $0xa58] sm:$0xff] }
  0x83   :  { %1814 = vmatprep.subr.bf16.mxu0 %v1813_v43  ;;  %1892 = vmatpush1.bf16.msra.mxu1 %v1891_v59  ;;  %v564_v43 = vld [vmem:[#allocation8 + $0x4b8] sm:$0xff]  ;;  %v1903_v53 = vpack.c.bf16 %v731_v52, %v725_v51  ;;  %v569_v59 = vld [vmem:[#allocation8 + $0x4e0] sm:$0xff]  ;;  %v575_v60 = vld [vmem:[#allocation8 + $0x510] sm:$0xff] }
  0x84   :  { %1894 = vmatprep.subr.bf16.mxu1 %v1893_v61  ;;  %v1845_v45 = vpack.c.bf16 %v564_v43, %v558_v42  ;;  %v1905_v61 = vpack.c.bf16 %v744_v58, %v738_v56  ;;  %v1851_v62 = vpack.c.bf16 %v575_v60, %v569_v59  ;;  %v737_v63 = vld [vmem:[#allocation8 + $0xa20] sm:$0xff]  ;;  %v743_v1 = vld [vmem:[#allocation8 + $0xa50] sm:$0xff]  ;;  %v750_v5 = vld [vmem:[#allocation8 + $0xa88] sm:$0xff] }
  0x85   :  { %v1907_v2 = vpack.c.bf16 %v743_v1, %v737_v63  ;;  %v581_v8 = vld [vmem:[#allocation8 + $0x540] sm:$0xff]  ;;  %v587_v0 = vld [vmem:[#allocation8 + $0x570] sm:$0xff]  ;;  %v594_v14 = vld [vmem:[#allocation8 + $0x5a8] sm:$0xff] }
  0x86   :  { %1816 = vmatpush1.bf16.msra.mxu0 %v1815_v54  ;;  %v570_v54 = vld [vmem:[#allocation8 + $0x4e8] sm:$0xff]  ;;  %v755_v12 = vld [vmem:[#allocation8 + $0xab0] sm:$0xff]  ;;  %v600_v15 = vld [vmem:[#allocation8 + $0x5d8] sm:$0xff] }
  0x87   :  { %1818 = vmatprep.subr.bf16.mxu0 %v1817_v55  ;;  %1896 = vmatpush1.bf16.msra.mxu1 %v1895_v7  ;;  %v576_v55 = vld [vmem:[#allocation8 + $0x518] sm:$0xff]  ;;  %v593_v19 = vld [vmem:[#allocation8 + $0x5a0] sm:$0xff]  ;;  %v599_v21 = vld [vmem:[#allocation8 + $0x5d0] sm:$0xff] }
  0x88   :  { %1898 = vmatprep.subr.bf16.mxu1 %v1897_v9  ;;  %v1849_v57 = vpack.c.bf16 %v576_v55, %v570_v54  ;;  %v756_v7 = vld [vmem:[#allocation8 + $0xab8] sm:$0xff]  ;;  %v767_v25 = vld [vmem:[#allocation8 + $0xb10] sm:$0xff]  ;;  %v774_v27 = vld [vmem:[#allocation8 + $0xb48] sm:$0xff] }
  0x89   :  { %v1909_v9 = vpack.c.bf16 %v756_v7, %v750_v5  ;;  %v768_v18 = vld [vmem:[#allocation8 + $0xb18] sm:$0xff]  ;;  %v422_v20 = vld [vmem:[#allocation8 + $0x48] sm:$0xff]  ;;  %v773_v31 = vld [vmem:[#allocation8 + $0xb40] sm:$0xff] }
  0x8a   :  { %1820 = vmatpush1.bf16.msra.mxu0 %v1819_v3  ;;  %v582_v3 = vld [vmem:[#allocation8 + $0x548] sm:$0xff]  ;;  %v780_v28 = vld [vmem:[#allocation8 + $0xb78] sm:$0xff]  ;;  %v779_v32 = vld [vmem:[#allocation8 + $0xb70] sm:$0xff] }
  0x8b   :  { %1822 = vmatprep.subr.bf16.mxu0 %v1821_v4  ;;  %1900 = vmatpush1.bf16.msra.mxu1 %v1899_v41  ;;  %v588_v4 = vld [vmem:[#allocation8 + $0x578] sm:$0xff]  ;;  %v785_v38 = vld [vmem:[#allocation8 + $0xba0] sm:$0xff]  ;;  %v798_v41 = vld [vmem:[#allocation8 + $0xc08] sm:$0xff] }
  0x8c   :  { %1902 = vmatprep.subr.bf16.mxu1 %v1901_v49  ;;  %v1853_v6 = vpack.c.bf16 %v588_v4, %v582_v3  ;;  %v792_v36 = vld [vmem:[#allocation8 + $0xbd8] sm:$0xff]  ;;  %v421_v7 = vld [vmem:[#allocation8 + $0x40] sm:$0xff] }
  0x8d   :  { %v804_v42 = vld [vmem:[#allocation8 + $0xc38] sm:$0xff] }
  0x8e   :  { %1824 = vmatpush1.bf16.msra.mxu0 %v1823_v10  ;;  %v1855_v10 = vpack.c.bf16 %v587_v0, %v581_v8  ;;  %v1925_v43 = vpack.c.bf16 %v804_v42, %v798_v41  ;;  %v111_v47 = vld [vmem:[#allocation7] sm:$0x3f] }
  0x8f   :  { %1826 = vmatprep.subr.bf16.mxu0 %v1825_v11  ;;  %1904 = vmatpush1.bf16.msra.mxu1 %v1903_v53  ;;  %v749_v11 = vld [vmem:[#allocation8 + $0xa80] sm:$0xff] }
  0x90   :  { %1906 = vmatprep.subr.bf16.mxu1 %v1905_v61  ;;  %v1911_v13 = vpack.c.bf16 %v755_v12, %v749_v11 }
  0x92   :  { %1828 = vmatpush1.bf16.msra.mxu0 %v1827_v16  ;;  %v762_v16 = vld [vmem:[#allocation8 + $0xae8] sm:$0xff] }
  0x93   :  { %1830 = vmatprep.subr.bf16.mxu0 %v1829_v17  ;;  %1908 = vmatpush1.bf16.msra.mxu1 %v1907_v2  ;;  %v1857_v17 = vpack.c.bf16 %v600_v15, %v594_v14  ;;  %v1913_v22 = vpack.c.bf16 %v768_v18, %v762_v16 }
  0x94   :  { %1910 = vmatprep.subr.bf16.mxu1 %v1909_v9  ;;  %v428_v9 = vld [vmem:[#allocation8 + $0x78] sm:$0xff] }
  0x96   :  { %1832 = vmatpush1.bf16.msra.mxu0 %v1831_v23  ;;  %v1859_v23 = vpack.c.bf16 %v599_v21, %v593_v19  ;;  %v427_v21 = vld [vmem:[#allocation8 + $0x70] sm:$0xff] }
  0x97   :  { %1834 = vmatprep.subr.bf16.mxu0 %v1833_v24  ;;  %1912 = vmatpush1.bf16.msra.mxu1 %v1911_v13  ;;  %v761_v24 = vld [vmem:[#allocation8 + $0xae0] sm:$0xff]  ;;  %v2610_v13 = vmov 1983009808  }
  0x98   :  { %v1915_v26 = vpack.c.bf16 %v767_v25, %v761_v24  ;;  %1914 = vmatprep.subr.bf16.mxu1 %v1913_v22  ;;  %v387_v14 = vunpack.c.l.s4 %v2610_v13  ;;  %v433_v22 = vld [vmem:[#allocation8 + $0xa0] sm:$0xff]  ;;  %v440_v24 = vld [vmem:[#allocation8 + $0xd8] sm:$0xff]  ;;  %v446_v25 = vld [vmem:[#allocation8 + $0x108] sm:$0xff] }
  0x99   :  { %v834_v13 = vld [vmem:[#allocation8 + $0xd28] sm:$0xff] }
  0x9a   :  { %1836 = vmatpush1.bf16.msra.mxu0 %v1835_v29  ;;  %v416_v29 = vld [vmem:[#allocation8 + $0x18] sm:$0xff] }
  0x9b   :  { %1838 = vmatprep.subr.bf16.mxu0 %v1837_v30  ;;  %1916 = vmatpush1.bf16.msra.mxu1 %v1915_v26  ;;  %v1917_v30 = vpack.c.bf16 %v780_v28, %v774_v27  ;;  %v1989_v33 = vpack.c.bf16 %v422_v20, %v416_v29  ;;  %v388_v26 = vunpack.c.0.s8 %v387_v14  ;;  %v1995_v28 = vpack.c.bf16 %v433_v22, %v427_v21  ;;  %v797_v29 = vld [vmem:[#allocation8 + $0xc00] sm:$0xff] }
  0x9d   :  { %1918 = vmatprep.subr.bf16.mxu1 %v1917_v30  ;;  %v803_v30 = vld [vmem:[#allocation8 + $0xc30] sm:$0xff] }
  0x9e   :  { %1840 = vmatpush1.bf16.msra.mxu0 %v1839_v34  ;;  %v1919_v34 = vpack.c.bf16 %v779_v32, %v773_v31  ;;  %v1997_v32 = vpack.c.bf16 %v446_v25, %v440_v24  ;;  %v833_v25 = vld [vmem:[#allocation8 + $0xd20] sm:$0xff] }
  0x9f   :  { %1842 = vmatprep.subr.bf16.mxu0 %v1841_v35  ;;  %v786_v35 = vld [vmem:[#allocation8 + $0xba8] sm:$0xff] }
  0xa0   :  { %1920 = vmatpush1.bf16.msra.mxu1 %v1919_v34  ;;  %v1921_v37 = vpack.c.bf16 %v792_v36, %v786_v35  ;;  %v445_v34 = vld [vmem:[#allocation8 + $0x100] sm:$0xff]  ;;  %v810_v35 = vld [vmem:[#allocation8 + $0xc68] sm:$0xff] }
  0xa2   :  { %1844 = vmatpush1.bf16.msra.mxu0 %v1843_v39  ;;  %v791_v39 = vld [vmem:[#allocation8 + $0xbd0] sm:$0xff]  ;;  %1922 = vmatprep.subr.bf16.mxu1 %v1921_v37  ;;  %v816_v37 = vld [vmem:[#allocation8 + $0xc98] sm:$0xff] }
  0xa3   :  { %1846 = vmatprep.subr.bf16.mxu0 %v1845_v45  ;;  %v1923_v40 = vpack.c.bf16 %v791_v39, %v785_v38  ;;  %v2719_v45 = vshrl.u32 %v113_v44, 7  ;;  %v452_v38 = vld [vmem:[#allocation8 + $0x138] sm:$0xff]  ;;  %v458_v39 = vld [vmem:[#allocation8 + $0x168] sm:$0xff] }
  0xa5   :  { %1924 = vmatpush1.bf16.msra.mxu1 %v1923_v40  ;;  %v115_v46 = vsub.s32 0, %v2719_v45  ;;  %v119_v48 = vsub.s32 1, %v2719_v45  ;;  %v123_v54 = vsub.s32 2, %v2719_v45  ;;  %v127_v56 = vsub.s32 3, %v2719_v45 }
  0xa6   :  { %1848 = vmatpush1.bf16.msra.mxu0 %v1847_v50  ;;  %1926 = vmatprep.subr.bf16.mxu1 %v1925_v43  ;;  %v135_v1 = vsub.s32 5, %v2719_v45  ;;  %v2749_v41 = vsub.s32 %v388_v26, %v2719_v45  ;;  %v1927_v43 = vpack.c.bf16 %v803_v30, %v797_v29  ;;  %v839_v26 = vld [vmem:[#allocation8 + $0xd50] sm:$0xff] }
  0xa7   :  { %1850 = vmatprep.subr.bf16.mxu0 %v1849_v57  ;;  %v116_v49 = vrot.slane %v111_v47, %v115_v46  ;;  %v120_v50 = vrot.slane %v111_v47, %v119_v48  ;;  %v124_v57 = vrot.slane %v111_v47, %v123_v54  ;;  %v128_v58 = vrot.slane %v111_v47, %v127_v56  ;;  %v475_v30 = vld [vmem:[#allocation8 + $0x1f0] sm:$0xff] }
  0xa8   :  { %v136_v8 = vrot.slane %v111_v47, %v135_v1 }
  0xaa   :  { %1852 = vmatpush1.bf16.msra.mxu0 %v1851_v62  ;;  %v131_v62 = vsub.s32 4, %v2719_v45 }
  0xab   :  { %1854 = vmatprep.subr.bf16.mxu0 %v1853_v6  ;;  %v415_v6 = vld [vmem:[#allocation8 + $0x10] sm:$0xff] }
  0xac   :  { %v132_v3 = vrot.slane %v111_v47, %v131_v62  ;;  %v1991_v16 = vpack.c.bf16 %v421_v7, %v415_v6  ;;  %v809_v47 = vld [vmem:[#allocation8 + $0xc60] sm:$0xff] }
  0xae   :  { %1856 = vmatpush1.bf16.msra.mxu0 %v1855_v10  ;;  %v434_v10 = vld [vmem:[#allocation8 + $0xa8] sm:$0xff] }
  0xaf   :  { %1858 = vmatprep.subr.bf16.mxu0 %v1857_v17  ;;  %v1993_v19 = vpack.c.bf16 %v434_v10, %v428_v9  ;;  %v463_v10 = vld [vmem:[#allocation8 + $0x190] sm:$0xff] }
  0xb2   :  { %1860 = vmatpush1.bf16.msra.mxu0 %v1859_v23 }
  0xb3   :  { %1990 = vmatprep.subr.bf16.mxu0 %v1989_v33  ;;  %v439_v33 = vld [vmem:[#allocation8 + $0xd0] sm:$0xff] }
  0xb4   :  { %v1999_v44 = vpack.c.bf16 %v445_v34, %v439_v33  ;;  %v488_v33 = vld [vmem:[#allocation8 + $0x258] sm:$0xff]  ;;  %v494_v34 = vld [vmem:[#allocation8 + $0x288] sm:$0xff] }
 0x138   :  { %v213_v51 = vpop.f32.mrb[0].mxu0 }
 0x139   :  { %v214_v52 = vadd.f32 %v213_v51, %v116_v49  ;;  %v215_v53 = vpop.f32.mrb[1].mxu0  ;;  %v815_v49 = vld [vmem:[#allocation8 + $0xc90] sm:$0xff]  ;;  %v1929_v51 = vpack.c.bf16 %v816_v37, %v810_v35 }
 0x13a   :  { %v216_v55 = vadd.f32 %v215_v53, %v120_v50  ;;  %v451_v53 = vld [vmem:[#allocation8 + $0x130] sm:$0xff] }
 0x13b   :  { %2402 = vtanh.f32 %v214_v52  ;;  %v2001_v52 = vpack.c.bf16 %v458_v39, %v452_v38  ;;  %v845_v38 = vld [vmem:[#allocation8 + $0xd80] sm:$0xff]  ;;  %v851_v39 = vld [vmem:[#allocation8 + $0xdb0] sm:$0xff] }
 0x13c   :  { %2404 = vtanh.f32 %v216_v55  ;;  %v457_v55 = vld [vmem:[#allocation8 + $0x160] sm:$0xff] }
 0x140   :  { %v284_v59 = vpop.f32.mrb[2].mxu0 }
 0x141   :  { %v285_v60 = vadd.f32 %v284_v59, %v124_v57  ;;  %v286_v61 = vpop.f32.mrb[3].mxu0  ;;  %v822_v57 = vld [vmem:[#allocation8 + $0xcc8] sm:$0xff]  ;;  %v464_v59 = vld [vmem:[#allocation8 + $0x198] sm:$0xff] }
 0x142   :  { %v287_v63 = vadd.f32 %v286_v61, %v128_v58  ;;  %v828_v58 = vld [vmem:[#allocation8 + $0xcf8] sm:$0xff] }
 0x143   :  { %2406 = vtanh.f32 %v285_v60  ;;  %v470_v60 = vld [vmem:[#allocation8 + $0x1c8] sm:$0xff] }
 0x144   :  { %2408 = vtanh.f32 %v287_v63  ;;  %v1931_v63 = vpack.c.bf16 %v815_v49, %v809_v47  ;;  %v2005_v9 = vpack.c.bf16 %v470_v60, %v464_v59  ;;  %v487_v47 = vld [vmem:[#allocation8 + $0x250] sm:$0xff]  ;;  %v493_v49 = vld [vmem:[#allocation8 + $0x280] sm:$0xff] }
 0x145   :  { %v2403_v2 = vpop.eup %2402  ;;  %v863_v59 = vld [vmem:[#allocation8 + $0xe10] sm:$0xff] }
 0x146   :  { %v2405_v4 = vpop.eup %2404  ;;  %v366_v5 = vmax.f32 %v2403_v2, 0.0 }
 0x147   :  { %v367_v0 = vmax.f32 %v2405_v4, 0.0  ;;  %v821_v4 = vld [vmem:[#allocation8 + $0xcc0] sm:$0xff] }
 0x148   :  { %v2739_v11 = vmin.f32 %v366_v5, 1.0  ;;  %v355_v12 = vpop.f32.mrb[4].mxu0  ;;  %v827_v5 = vld [vmem:[#allocation8 + $0xcf0] sm:$0xff] }
 0x149   :  { %v2741_v15 = vmin.f32 %v367_v0, 1.0  ;;  %v356_v17 = vadd.f32 %v355_v12, %v132_v3  ;;  %v357_v18 = vpop.f32.mrb[5].mxu0  ;;  %v2003_v3 = vpack.c.bf16 %v457_v55, %v451_v53  ;;  %v1933_v0 = vpack.c.bf16 %v828_v58, %v822_v57  ;;  %v469_v12 = vld [vmem:[#allocation8 + $0x1c0] sm:$0xff]  ;;  %v506_v53 = vld [vmem:[#allocation8 + $0x2e8] sm:$0xff] }
 0x14a   :  { %v358_v23 = vadd.f32 %v357_v18, %v136_v8  ;;  %v482_v18 = vld [vmem:[#allocation8 + $0x228] sm:$0xff]  ;;  %v2007_v24 = vpack.c.bf16 %v469_v12, %v463_v10  ;;  %v1943_v55 = vpack.c.bf16 %v851_v39, %v845_v38  ;;  %v2015_v57 = vpack.c.bf16 %v493_v49, %v487_v47  ;;  %v857_v58 = vld [vmem:[#allocation8 + $0xde0] sm:$0xff]  ;;  %v912_v49 = vld [vmem:[#allocation8 + $0xf98] sm:$0xff] }
 0x14b   :  { %1085 = vmatprep.mubr.f32.mxu0 %v2741_v15  ;;  %2410 = vtanh.f32 %v356_v17  ;;  %v384_v50 = vcombine.low %v2739_v11, %v2741_v15  ;;  %v476_v17 = vld [vmem:[#allocation8 + $0x1f8] sm:$0xff]  ;;  %v906_v47 = vld [vmem:[#allocation8 + $0xf68] sm:$0xff] }
 0x14c   :  { %1086 = vmatmul.mubr.f32.vlgmr.msra.gmra.mrb[6].mxu0 %v2739_v11  ;;  %2412 = vtanh.f32 %v358_v23  ;;  %v1935_v23 = vpack.c.bf16 %v827_v5, %v821_v4  ;;  %v2009_v29 = vpack.c.bf16 %v482_v18, %v476_v17  ;;  %v876_v4 = vld [vmem:[#allocation8 + $0xe78] sm:$0xff] }
 0x14d   :  { %v2407_v27 = vpop.eup %2406  ;;  %1992 = vmatpush1.bf16.msra.mxu0 %v1991_v16  ;;  %1298 = vmatprep.mubr.f32.mxu0 %v2741_v15  ;;  %v392_v6 = vrot.slane %v384_v50, %v2749_v41  ;;  %v840_v16 = vld [vmem:[#allocation8 + $0xd58] sm:$0xff]  ;;  %v858_v50 = vld [vmem:[#allocation8 + $0xde8] sm:$0xff] }
 0x14e   :  { %v2409_v20 = vpop.eup %2408  ;;  %v368_v31 = vmax.f32 %v2407_v27, 0.0  ;;  %1994 = vmatprep.subr.bf16.mxu0 %v1993_v19  ;;  %v512_v5 = vld [vmem:[#allocation8 + $0x318] sm:$0xff] }
 0x14f   :  { %v369_v36 = vmax.f32 %v2409_v20, 0.0  ;;  %v481_v20 = vld [vmem:[#allocation8 + $0x220] sm:$0xff]  ;;  %v888_v17 = vld [vmem:[#allocation8 + $0xed8] sm:$0xff] }
 0x150   :  { %v2746_v40 = vmin.f32 %v368_v31, 1.0  ;;  %v846_v31 = vld [vmem:[#allocation8 + $0xd88] sm:$0xff]  ;;  %v2011_v37 = vpack.c.bf16 %v481_v20, %v475_v30  ;;  %v524_v18 = vld [vmem:[#allocation8 + $0x378] sm:$0xff]  ;;  %v529_v30 = vld [vmem:[#allocation8 + $0x3a0] sm:$0xff] }
 0x151   :  { %v2751_v42 = vmin.f32 %v369_v36, 1.0  ;;  %1996 = vmatpush1.bf16.msra.mxu0 %v1995_v28  ;;  %v1937_v28 = vpack.c.bf16 %v840_v16, %v834_v13  ;;  %v1939_v36 = vpack.c.bf16 %v839_v26, %v833_v25  ;;  %v511_v13 = vld [vmem:[#allocation8 + $0x310] sm:$0xff]  ;;  %v882_v16 = vld [vmem:[#allocation8 + $0xea8] sm:$0xff] }
 0x152   :  { %1998 = vmatprep.subr.bf16.mxu0 %v1997_v32  ;;  %v852_v32 = vld [vmem:[#allocation8 + $0xdb8] sm:$0xff]  ;;  %v887_v25 = vld [vmem:[#allocation8 + $0xed0] sm:$0xff]  ;;  %v1953_v26 = vpack.c.bf16 %v888_v17, %v882_v16  ;;  %v894_v20 = vld [vmem:[#allocation8 + $0xf08] sm:$0xff] }
 0x153   :  { %1156 = vmatprep.mubr.f32.mxu1 %v2751_v42  ;;  %v385_v61 = vcombine.low %v2746_v40, %v2751_v42  ;;  %v572_v16 = vld [vmem:[#allocation8 + $0x4f8] sm:$0xff]  ;;  %v578_v17 = vld [vmem:[#allocation8 + $0x528] sm:$0xff] }
 0x154   :  { %1157 = vmatmul.mubr.f32.vlgmr.msra.gmra.mrb[0].mxu1 %v2746_v40 }
 0x155   :  { %v2411_v2 = vpop.eup %2410  ;;  %1928 = vmatpush1.bf16.msra.mxu1 %v1927_v43  ;;  %2000 = vmatpush1.bf16.msra.mxu0 %v1999_v44  ;;  %v399_v7 = vrot.slane %v385_v61, %v2749_v41  ;;  %v1941_v43 = vpack.c.bf16 %v852_v32, %v846_v31  ;;  %v2013_v44 = vpack.c.bf16 %v494_v34, %v488_v33  ;;  %v900_v31 = vld [vmem:[#allocation8 + $0xf38] sm:$0xff]  ;;  %v542_v33 = vld [vmem:[#allocation8 + $0x408] sm:$0xff] }
 0x156   :  { %v2413_v8 = vpop.eup %2412  ;;  %1930 = vmatprep.subr.bf16.mxu1 %v1929_v51  ;;  %2002 = vmatprep.subr.bf16.mxu0 %v2001_v52  ;;  %v370_v14 = vmax.f32 %v2411_v2, 0.0  ;;  %v864_v51 = vld [vmem:[#allocation8 + $0xe18] sm:$0xff]  ;;  %v505_v2 = vld [vmem:[#allocation8 + $0x2e0] sm:$0xff]  ;;  %v1957_v38 = vpack.c.bf16 %v900_v31, %v894_v20  ;;  %v590_v31 = vld [vmem:[#allocation8 + $0x588] sm:$0xff] }
 0x157   :  { %v371_v19 = vmax.f32 %v2413_v8, 0.0  ;;  %v400_v21 = vcombine.low %v392_v6, %v399_v7  ;;  %v500_v52 = vld [vmem:[#allocation8 + $0x2b8] sm:$0xff]  ;;  %v1945_v60 = vpack.c.bf16 %v864_v51, %v858_v50  ;;  %v518_v6 = vld [vmem:[#allocation8 + $0x348] sm:$0xff]  ;;  %v1947_v7 = vpack.c.bf16 %v863_v59, %v857_v58 }
 0x158   :  { %v2761_v22 = vmin.f32 %v370_v14, 1.0  ;;  %v2017_v61 = vpack.c.bf16 %v506_v53, %v500_v52  ;;  %v2021_v12 = vpack.c.bf16 %v518_v6, %v512_v5  ;;  %v517_v14 = vld [vmem:[#allocation8 + $0x340] sm:$0xff]  ;;  %v536_v32 = vld [vmem:[#allocation8 + $0x3d8] sm:$0xff]  ;;  %v554_v51 = vld [vmem:[#allocation8 + $0x468] sm:$0xff]  ;;  %v1961_v58 = vpack.c.bf16 %v912_v49, %v906_v47 }
 0x159   :  { %1932 = vmatpush1.bf16.msra.mxu1 %v1931_v63  ;;  %2004 = vmatpush1.bf16.msra.mxu0 %v2003_v3  ;;  %v2763_v27 = vmin.f32 %v371_v19, 1.0  ;;  %411 = vst [vmem:[#allocation11] sm:$0xff] %v400_v21  ;;  %v499_v63 = vld [vmem:[#allocation8 + $0x2b0] sm:$0xff]  ;;  %v870_v3 = vld [vmem:[#allocation8 + $0xe48] sm:$0xff]  ;;  %v2029_v39 = vpack.c.bf16 %v542_v33, %v536_v32  ;;  %v548_v50 = vld [vmem:[#allocation8 + $0x438] sm:$0xff] }
 0x15a   :  { %1934 = vmatprep.subr.bf16.mxu1 %v1933_v0  ;;  %2006 = vmatprep.subr.bf16.mxu0 %v2005_v9  ;;  %v2019_v8 = vpack.c.bf16 %v505_v2, %v499_v63  ;;  %v869_v0 = vld [vmem:[#allocation8 + $0xe40] sm:$0xff]  ;;  %v875_v9 = vld [vmem:[#allocation8 + $0xe70] sm:$0xff]  ;;  %v1949_v10 = vpack.c.bf16 %v876_v4, %v870_v3  ;;  %v530_v19 = vld [vmem:[#allocation8 + $0x3a8] sm:$0xff]  ;;  %v2033_v59 = vpack.c.bf16 %v554_v51, %v548_v50 }
 0x15b   :  { %1227 = vmatprep.mubr.f32.mxu1 %v2763_v27  ;;  %v401_v35 = vcombine.low %v2761_v22, %v2763_v27  ;;  %v1951_v21 = vpack.c.bf16 %v875_v9, %v869_v0  ;;  %v918_v63 = vld [vmem:[#allocation8 + $0xfc8] sm:$0xff]  ;;  %v924_v2 = vld [vmem:[#allocation8 + $0xff8] sm:$0xff] }
 0x15c   :  { %v560_v3 = vld [vmem:[#allocation8 + $0x498] sm:$0xff]  ;;  %v566_v4 = vld [vmem:[#allocation8 + $0x4c8] sm:$0xff]  ;;  %v1965_v0 = vpack.c.bf16 %v924_v2, %v918_v63 }
 0x15d   :  { %1936 = vmatpush1.bf16.msra.mxu1 %v1935_v23  ;;  %2008 = vmatpush1.bf16.msra.mxu0 %v2007_v24  ;;  %1765 = vst.sshfl [vmem:[#allocation11 + $0x8] sm:$0x33 pattern:$0x76325410] %v401_v35  ;;  %v2023_v23 = vpack.c.bf16 %v517_v14, %v511_v13  ;;  %v881_v24 = vld [vmem:[#allocation8 + $0xea0] sm:$0xff]  ;;  %v2037_v9 = vpack.c.bf16 %v566_v4, %v560_v3  ;;  %v930_v13 = vld [vmem:[#allocation8 + $0x1028] sm:$0xff] }
 0x15e   :  { %1938 = vmatprep.subr.bf16.mxu1 %v1937_v28  ;;  %2010 = vmatprep.subr.bf16.mxu0 %v2009_v29  ;;  %v2025_v28 = vpack.c.bf16 %v530_v19, %v524_v18  ;;  %v523_v29 = vld [vmem:[#allocation8 + $0x370] sm:$0xff]  ;;  %v1955_v34 = vpack.c.bf16 %v887_v25, %v881_v24  ;;  %v936_v14 = vld [vmem:[#allocation8 + $0x1058] sm:$0xff]  ;;  %v2041_v25 = vpack.c.bf16 %v578_v17, %v572_v16  ;;  %v602_v49 = vld [vmem:[#allocation8 + $0x5e8] sm:$0xff] }
 0x15f   :  { %v2027_v35 = vpack.c.bf16 %v529_v30, %v523_v29  ;;  %v1969_v24 = vpack.c.bf16 %v936_v14, %v930_v13  ;;  %v942_v29 = vld [vmem:[#allocation8 + $0x1088] sm:$0xff]  ;;  %v948_v30 = vld [vmem:[#allocation8 + $0x10b8] sm:$0xff] }
 0x160   :  { %v584_v20 = vld [vmem:[#allocation8 + $0x558] sm:$0xff]  ;;  %v614_v2 = vld [vmem:[#allocation8 + $0x648] sm:$0xff] }
 0x161   :  { %1940 = vmatpush1.bf16.msra.mxu1 %v1939_v36  ;;  %2012 = vmatpush1.bf16.msra.mxu0 %v2011_v37  ;;  %v893_v36 = vld [vmem:[#allocation8 + $0xf00] sm:$0xff]  ;;  %v899_v37 = vld [vmem:[#allocation8 + $0xf30] sm:$0xff]  ;;  %v596_v47 = vld [vmem:[#allocation8 + $0x5b8] sm:$0xff] }
 0x162   :  { %1942 = vmatprep.subr.bf16.mxu1 %v1941_v43  ;;  %2014 = vmatprep.subr.bf16.mxu0 %v2013_v44  ;;  %v535_v43 = vld [vmem:[#allocation8 + $0x3d0] sm:$0xff]  ;;  %v541_v44 = vld [vmem:[#allocation8 + $0x400] sm:$0xff]  ;;  %v1959_v52 = vpack.c.bf16 %v899_v37, %v893_v36  ;;  %v1973_v36 = vpack.c.bf16 %v948_v30, %v942_v29  ;;  %v2045_v37 = vpack.c.bf16 %v590_v31, %v584_v20  ;;  %v608_v63 = vld [vmem:[#allocation8 + $0x618] sm:$0xff] }
 0x163   :  { %v2031_v53 = vpack.c.bf16 %v541_v44, %v535_v43  ;;  %v954_v43 = vld [vmem:[#allocation8 + $0x10e8] sm:$0xff]  ;;  %v960_v44 = vld [vmem:[#allocation8 + $0x1118] sm:$0xff] }
 0x164   :  { %v620_v13 = vld [vmem:[#allocation8 + $0x678] sm:$0xff]  ;;  %v626_v14 = vld [vmem:[#allocation8 + $0x6a8] sm:$0xff] }
 0x165   :  { %1944 = vmatpush1.bf16.msra.mxu1 %v1943_v55  ;;  %2016 = vmatpush1.bf16.msra.mxu0 %v2015_v57  ;;  %v905_v55 = vld [vmem:[#allocation8 + $0xf60] sm:$0xff]  ;;  %v911_v57 = vld [vmem:[#allocation8 + $0xf90] sm:$0xff]  ;;  %v418_v29 = vld [vmem:[#allocation8 + $0x28] sm:$0xff] }
 0x166   :  { %1946 = vmatprep.subr.bf16.mxu1 %v1945_v60  ;;  %2018 = vmatprep.subr.bf16.mxu0 %v2017_v61  ;;  %v547_v60 = vld [vmem:[#allocation8 + $0x430] sm:$0xff]  ;;  %v553_v61 = vld [vmem:[#allocation8 + $0x460] sm:$0xff]  ;;  %v1963_v5 = vpack.c.bf16 %v911_v57, %v905_v55  ;;  %v1977_v55 = vpack.c.bf16 %v960_v44, %v954_v43  ;;  %v2049_v57 = vpack.c.bf16 %v602_v49, %v596_v47  ;;  %v424_v30 = vld [vmem:[#allocation8 + $0x58] sm:$0xff] }
 0x167   :  { %v2035_v6 = vpack.c.bf16 %v553_v61, %v547_v60  ;;  %v966_v60 = vld [vmem:[#allocation8 + $0x1148] sm:$0xff]  ;;  %v972_v61 = vld [vmem:[#allocation8 + $0x1178] sm:$0xff] }
 0x168   :  { %v430_v43 = vld [vmem:[#allocation8 + $0x88] sm:$0xff]  ;;  %v436_v44 = vld [vmem:[#allocation8 + $0xb8] sm:$0xff] }
 0x169   :  { %1948 = vmatpush1.bf16.msra.mxu1 %v1947_v7  ;;  %2020 = vmatpush1.bf16.msra.mxu0 %v2019_v8  ;;  %v917_v7 = vld [vmem:[#allocation8 + $0xfc0] sm:$0xff]  ;;  %v923_v8 = vld [vmem:[#allocation8 + $0xff0] sm:$0xff] }
 0x16a   :  { %1950 = vmatprep.subr.bf16.mxu1 %v1949_v10  ;;  %2022 = vmatprep.subr.bf16.mxu0 %v2021_v12  ;;  %v559_v10 = vld [vmem:[#allocation8 + $0x490] sm:$0xff]  ;;  %v565_v12 = vld [vmem:[#allocation8 + $0x4c0] sm:$0xff]  ;;  %v1967_v18 = vpack.c.bf16 %v923_v8, %v917_v7  ;;  %v2053_v7 = vpack.c.bf16 %v614_v2, %v608_v63 }
 0x16b   :  { %v2039_v19 = vpack.c.bf16 %v565_v12, %v559_v10  ;;  %v971_v8 = vld [vmem:[#allocation8 + $0x1170] sm:$0xff]  ;;  %v978_v10 = vld [vmem:[#allocation8 + $0x11a8] sm:$0xff]  ;;  %v984_v12 = vld [vmem:[#allocation8 + $0x11d8] sm:$0xff] }
 0x16d   :  { %1952 = vmatpush1.bf16.msra.mxu1 %v1951_v21  ;;  %2024 = vmatpush1.bf16.msra.mxu0 %v2023_v23  ;;  %v929_v21 = vld [vmem:[#allocation8 + $0x1020] sm:$0xff]  ;;  %v935_v23 = vld [vmem:[#allocation8 + $0x1050] sm:$0xff] }
 0x16e   :  { %1954 = vmatprep.subr.bf16.mxu1 %v1953_v26  ;;  %2026 = vmatprep.subr.bf16.mxu0 %v2025_v28  ;;  %v571_v26 = vld [vmem:[#allocation8 + $0x4f0] sm:$0xff]  ;;  %v577_v28 = vld [vmem:[#allocation8 + $0x520] sm:$0xff]  ;;  %v1971_v32 = vpack.c.bf16 %v935_v23, %v929_v21  ;;  %v1985_v21 = vpack.c.bf16 %v984_v12, %v978_v10  ;;  %v454_v10 = vld [vmem:[#allocation8 + $0x148] sm:$0xff] }
 0x16f   :  { %v2043_v33 = vpack.c.bf16 %v577_v28, %v571_v26  ;;  %v619_v23 = vld [vmem:[#allocation8 + $0x670] sm:$0xff]  ;;  %v2057_v26 = vpack.c.bf16 %v626_v14, %v620_v13  ;;  %v638_v28 = vld [vmem:[#allocation8 + $0x708] sm:$0xff]  ;;  %v460_v12 = vld [vmem:[#allocation8 + $0x178] sm:$0xff] }
 0x171   :  { %1956 = vmatpush1.bf16.msra.mxu1 %v1955_v34  ;;  %2028 = vmatpush1.bf16.msra.mxu0 %v2027_v35  ;;  %v941_v34 = vld [vmem:[#allocation8 + $0x1080] sm:$0xff]  ;;  %v947_v35 = vld [vmem:[#allocation8 + $0x10b0] sm:$0xff] }
 0x172   :  { %1958 = vmatprep.subr.bf16.mxu1 %v1957_v38  ;;  %2030 = vmatprep.subr.bf16.mxu0 %v2029_v39  ;;  %v583_v38 = vld [vmem:[#allocation8 + $0x550] sm:$0xff]  ;;  %v589_v39 = vld [vmem:[#allocation8 + $0x580] sm:$0xff]  ;;  %v1975_v50 = vpack.c.bf16 %v947_v35, %v941_v34  ;;  %v2181_v34 = vpack.c.bf16 %v424_v30, %v418_v29 }
 0x173   :  { %v2047_v51 = vpack.c.bf16 %v589_v39, %v583_v38  ;;  %v637_v35 = vld [vmem:[#allocation8 + $0x700] sm:$0xff]  ;;  %v644_v38 = vld [vmem:[#allocation8 + $0x738] sm:$0xff]  ;;  %v650_v39 = vld [vmem:[#allocation8 + $0x768] sm:$0xff] }
 0x174   :  { %v679_v30 = vld [vmem:[#allocation8 + $0x850] sm:$0xff] }
 0x175   :  { %1960 = vmatpush1.bf16.msra.mxu1 %v1959_v52  ;;  %2032 = vmatpush1.bf16.msra.mxu0 %v2031_v53  ;;  %v953_v52 = vld [vmem:[#allocation8 + $0x10e0] sm:$0xff]  ;;  %v959_v53 = vld [vmem:[#allocation8 + $0x1110] sm:$0xff] }
 0x176   :  { %1962 = vmatprep.subr.bf16.mxu1 %v1961_v58  ;;  %2034 = vmatprep.subr.bf16.mxu0 %v2033_v59  ;;  %v595_v58 = vld [vmem:[#allocation8 + $0x5b0] sm:$0xff]  ;;  %v601_v59 = vld [vmem:[#allocation8 + $0x5e0] sm:$0xff]  ;;  %v1979_v3 = vpack.c.bf16 %v959_v53, %v953_v52  ;;  %v2065_v52 = vpack.c.bf16 %v650_v39, %v644_v38  ;;  %v484_v38 = vld [vmem:[#allocation8 + $0x238] sm:$0xff] }
 0x177   :  { %v2051_v4 = vpack.c.bf16 %v601_v59, %v595_v58  ;;  %v429_v53 = vld [vmem:[#allocation8 + $0x80] sm:$0xff]  ;;  %v2185_v58 = vpack.c.bf16 %v436_v44, %v430_v43  ;;  %v662_v59 = vld [vmem:[#allocation8 + $0x7c8] sm:$0xff]  ;;  %v691_v44 = vld [vmem:[#allocation8 + $0x8b0] sm:$0xff] }
 0x179   :  { %1964 = vmatpush1.bf16.msra.mxu1 %v1963_v5  ;;  %2036 = vmatpush1.bf16.msra.mxu0 %v2035_v6  ;;  %v965_v5 = vld [vmem:[#allocation8 + $0x1140] sm:$0xff]  ;;  %v1981_v6 = vpack.c.bf16 %v972_v61, %v966_v60  ;;  %v442_v60 = vld [vmem:[#allocation8 + $0xe8] sm:$0xff]  ;;  %v448_v61 = vld [vmem:[#allocation8 + $0x118] sm:$0xff] }
 0x17a   :  { %1966 = vmatprep.subr.bf16.mxu1 %v1965_v0  ;;  %2038 = vmatprep.subr.bf16.mxu0 %v2037_v9  ;;  %v607_v0 = vld [vmem:[#allocation8 + $0x610] sm:$0xff]  ;;  %v613_v9 = vld [vmem:[#allocation8 + $0x640] sm:$0xff]  ;;  %v1983_v16 = vpack.c.bf16 %v971_v8, %v965_v5 }
 0x17b   :  { %v2055_v17 = vpack.c.bf16 %v613_v9, %v607_v0  ;;  %v447_v8 = vld [vmem:[#allocation8 + $0x110] sm:$0xff]  ;;  %v668_v0 = vld [vmem:[#allocation8 + $0x7f8] sm:$0xff]  ;;  %v674_v9 = vld [vmem:[#allocation8 + $0x828] sm:$0xff] }
 0x17d   :  { %1968 = vmatpush1.bf16.msra.mxu1 %v1967_v18  ;;  %2040 = vmatpush1.bf16.msra.mxu0 %v2039_v19  ;;  %v977_v18 = vld [vmem:[#allocation8 + $0x11a0] sm:$0xff]  ;;  %v983_v19 = vld [vmem:[#allocation8 + $0x11d0] sm:$0xff] }
 0x17e   :  { %1970 = vmatprep.subr.bf16.mxu1 %v1969_v24  ;;  %2042 = vmatprep.subr.bf16.mxu0 %v2041_v25  ;;  %v625_v24 = vld [vmem:[#allocation8 + $0x6a0] sm:$0xff]  ;;  %v632_v25 = vld [vmem:[#allocation8 + $0x6d8] sm:$0xff]  ;;  %v1987_v20 = vpack.c.bf16 %v983_v19, %v977_v18  ;;  %v2073_v18 = vpack.c.bf16 %v674_v9, %v668_v0 }
 0x17f   :  { %v2059_v31 = vpack.c.bf16 %v625_v24, %v619_v23  ;;  %v453_v19 = vld [vmem:[#allocation8 + $0x140] sm:$0xff]  ;;  %v680_v23 = vld [vmem:[#allocation8 + $0x858] sm:$0xff]  ;;  %v686_v24 = vld [vmem:[#allocation8 + $0x888] sm:$0xff] }
 0x180   :  { %v508_v0 = vld [vmem:[#allocation8 + $0x2f8] sm:$0xff] }
 0x181   :  { %1972 = vmatpush1.bf16.msra.mxu1 %v1971_v32  ;;  %2044 = vmatpush1.bf16.msra.mxu0 %v2043_v33  ;;  %v631_v32 = vld [vmem:[#allocation8 + $0x6d0] sm:$0xff]  ;;  %v2061_v33 = vpack.c.bf16 %v638_v28, %v632_v25  ;;  %v466_v25 = vld [vmem:[#allocation8 + $0x1a8] sm:$0xff] }
 0x182   :  { %1974 = vmatprep.subr.bf16.mxu1 %v1973_v36  ;;  %2046 = vmatprep.subr.bf16.mxu0 %v2045_v37  ;;  %v417_v36 = vld [vmem:[#allocation8 + $0x20] sm:$0xff]  ;;  %v423_v37 = vld [vmem:[#allocation8 + $0x50] sm:$0xff]  ;;  %v2063_v47 = vpack.c.bf16 %v637_v35, %v631_v32  ;;  %v692_v35 = vld [vmem:[#allocation8 + $0x8b8] sm:$0xff] }
 0x183   :  { %v2183_v49 = vpack.c.bf16 %v423_v37, %v417_v36  ;;  %v698_v36 = vld [vmem:[#allocation8 + $0x8e8] sm:$0xff] }
 0x184   :  { %v478_v37 = vld [vmem:[#allocation8 + $0x208] sm:$0xff] }
 0x185   :  { %1976 = vmatpush1.bf16.msra.mxu1 %v1975_v50  ;;  %2048 = vmatpush1.bf16.msra.mxu0 %v2047_v51  ;;  %v643_v50 = vld [vmem:[#allocation8 + $0x730] sm:$0xff]  ;;  %v649_v51 = vld [vmem:[#allocation8 + $0x760] sm:$0xff] }
 0x186   :  { %1978 = vmatprep.subr.bf16.mxu1 %v1977_v55  ;;  %2050 = vmatprep.subr.bf16.mxu0 %v2049_v57  ;;  %v435_v55 = vld [vmem:[#allocation8 + $0xb0] sm:$0xff]  ;;  %v656_v57 = vld [vmem:[#allocation8 + $0x798] sm:$0xff]  ;;  %v2067_v63 = vpack.c.bf16 %v649_v51, %v643_v50  ;;  %v2201_v50 = vpack.c.bf16 %v484_v38, %v478_v37  ;;  %v477_v51 = vld [vmem:[#allocation8 + $0x200] sm:$0xff] }
 0x187   :  { %v2187_v2 = vpack.c.bf16 %v435_v55, %v429_v53  ;;  %v2069_v5 = vpack.c.bf16 %v662_v59, %v656_v57  ;;  %v704_v53 = vld [vmem:[#allocation8 + $0x918] sm:$0xff]  ;;  %v710_v55 = vld [vmem:[#allocation8 + $0x948] sm:$0xff]  ;;  %v739_v38 = vld [vmem:[#allocation8 + $0xa30] sm:$0xff] }
 0x188   :  { %v490_v57 = vld [vmem:[#allocation8 + $0x268] sm:$0xff] }
 0x189   :  { %1980 = vmatpush1.bf16.msra.mxu1 %v1979_v3  ;;  %2052 = vmatpush1.bf16.msra.mxu0 %v2051_v4  ;;  %v655_v3 = vld [vmem:[#allocation8 + $0x790] sm:$0xff]  ;;  %v661_v4 = vld [vmem:[#allocation8 + $0x7c0] sm:$0xff] }
 0x18a   :  { %1982 = vmatprep.subr.bf16.mxu1 %v1981_v6  ;;  %2054 = vmatprep.subr.bf16.mxu0 %v2053_v7  ;;  %v2189_v6 = vpack.c.bf16 %v448_v61, %v442_v60  ;;  %v441_v7 = vld [vmem:[#allocation8 + $0xe0] sm:$0xff]  ;;  %v2071_v13 = vpack.c.bf16 %v661_v4, %v655_v3  ;;  %v703_v61 = vld [vmem:[#allocation8 + $0x910] sm:$0xff] }
 0x18b   :  { %v2191_v14 = vpack.c.bf16 %v447_v8, %v441_v7  ;;  %v489_v4 = vld [vmem:[#allocation8 + $0x260] sm:$0xff]  ;;  %v722_v7 = vld [vmem:[#allocation8 + $0x9a8] sm:$0xff] }
 0x18c   :  { %1299 = vmatmul.mubr.f32.vlgmr.msra.gmra.mrb[8].mxu0 %v2739_v11  ;;  %v502_v8 = vld [vmem:[#allocation8 + $0x2c8] sm:$0xff] }
 0x18d   :  { %1984 = vmatpush1.bf16.msra.mxu1 %v1983_v16  ;;  %2056 = vmatpush1.bf16.msra.mxu0 %v2055_v17  ;;  %v667_v16 = vld [vmem:[#allocation8 + $0x7f0] sm:$0xff]  ;;  %v673_v17 = vld [vmem:[#allocation8 + $0x820] sm:$0xff] }
 0x18e   :  { %1369 = vmatprep.mubr.f32.mxu0 %v2751_v42  ;;  %1986 = vmatprep.subr.bf16.mxu1 %v1985_v21  ;;  %v459_v21 = vld [vmem:[#allocation8 + $0x170] sm:$0xff]  ;;  %v2075_v28 = vpack.c.bf16 %v673_v17, %v667_v16  ;;  %v2209_v16 = vpack.c.bf16 %v508_v0, %v502_v8  ;;  %v501_v17 = vld [vmem:[#allocation8 + $0x2c0] sm:$0xff] }
 0x18f   :  { %2058 = vmatprep.subr.bf16.mxu0 %v2057_v26  ;;  %v472_v26 = vld [vmem:[#allocation8 + $0x1d8] sm:$0xff]  ;;  %v2195_v29 = vpack.c.bf16 %v459_v21, %v453_v19  ;;  %v734_v19 = vld [vmem:[#allocation8 + $0xa08] sm:$0xff]  ;;  %v763_v0 = vld [vmem:[#allocation8 + $0xaf0] sm:$0xff] }
 0x190   :  { %v2197_v32 = vpack.c.bf16 %v472_v26, %v466_v25  ;;  %v514_v21 = vld [vmem:[#allocation8 + $0x328] sm:$0xff]  ;;  %v727_v26 = vld [vmem:[#allocation8 + $0x9d0] sm:$0xff] }
 0x191   :  { %1988 = vmatpush1.bf16.msra.mxu1 %v1987_v20  ;;  %2060 = vmatpush1.bf16.msra.mxu0 %v2059_v31  ;;  %v685_v20 = vld [vmem:[#allocation8 + $0x880] sm:$0xff]  ;;  %v2077_v31 = vpack.c.bf16 %v686_v24, %v680_v23  ;;  %v520_v23 = vld [vmem:[#allocation8 + $0x358] sm:$0xff] }
 0x192   :  { %2062 = vmatprep.subr.bf16.mxu0 %v2061_v33  ;;  %2182 = vmatprep.subr.bf16.mxu1 %v2181_v34  ;;  %v465_v33 = vld [vmem:[#allocation8 + $0x1a0] sm:$0xff]  ;;  %v471_v34 = vld [vmem:[#allocation8 + $0x1d0] sm:$0xff]  ;;  %v2079_v39 = vpack.c.bf16 %v685_v20, %v679_v30  ;;  %v2213_v30 = vpack.c.bf16 %v520_v23, %v514_v21 }
 0x193   :  { %v2199_v43 = vpack.c.bf16 %v471_v34, %v465_v33  ;;  %v513_v20 = vld [vmem:[#allocation8 + $0x320] sm:$0xff]  ;;  %v746_v33 = vld [vmem:[#allocation8 + $0xa68] sm:$0xff]  ;;  %v775_v23 = vld [vmem:[#allocation8 + $0xb50] sm:$0xff] }
 0x194   :  { %1228 = vmatmul.mubr.f32.vlgmr.msra.gmra.mrb[0].mxu1 %v2761_v22  ;;  %v526_v34 = vld [vmem:[#allocation8 + $0x388] sm:$0xff] }
 0x195   :  { %2064 = vmatpush1.bf16.msra.mxu0 %v2063_v47  ;;  %2184 = vmatpush1.bf16.msra.mxu1 %v2183_v49  ;;  %v697_v47 = vld [vmem:[#allocation8 + $0x8e0] sm:$0xff]  ;;  %v2081_v49 = vpack.c.bf16 %v698_v36, %v692_v35  ;;  %v532_v35 = vld [vmem:[#allocation8 + $0x3b8] sm:$0xff] }
 0x196   :  { %1511 = vmatprep.mubr.f32.mxu1 %v2741_v15  ;;  %2066 = vmatprep.subr.bf16.mxu0 %v2065_v52  ;;  %v2193_v15 = vpack.c.bf16 %v460_v12, %v454_v10  ;;  %v483_v52 = vld [vmem:[#allocation8 + $0x230] sm:$0xff]  ;;  %v2083_v59 = vpack.c.bf16 %v697_v47, %v691_v44  ;;  %v2217_v44 = vpack.c.bf16 %v532_v35, %v526_v34  ;;  %v525_v47 = vld [vmem:[#allocation8 + $0x380] sm:$0xff] }
 0x197   :  { %2186 = vmatprep.subr.bf16.mxu1 %v2185_v58  ;;  %v496_v58 = vld [vmem:[#allocation8 + $0x298] sm:$0xff]  ;;  %v2203_v60 = vpack.c.bf16 %v483_v52, %v477_v51  ;;  %v715_v12 = vld [vmem:[#allocation8 + $0x970] sm:$0xff]  ;;  %v758_v51 = vld [vmem:[#allocation8 + $0xac8] sm:$0xff] }
 0x198   :  { %v2205_v3 = vpack.c.bf16 %v496_v58, %v490_v57  ;;  %v538_v52 = vld [vmem:[#allocation8 + $0x3e8] sm:$0xff]  ;;  %v751_v58 = vld [vmem:[#allocation8 + $0xa90] sm:$0xff] }
 0x199   :  { %2068 = vmatpush1.bf16.msra.mxu0 %v2067_v63  ;;  %2188 = vmatpush1.bf16.msra.mxu1 %v2187_v2  ;;  %v709_v63 = vld [vmem:[#allocation8 + $0x940] sm:$0xff]  ;;  %v2085_v2 = vpack.c.bf16 %v710_v55, %v704_v53  ;;  %v544_v53 = vld [vmem:[#allocation8 + $0x418] sm:$0xff]  ;;  %v787_v35 = vld [vmem:[#allocation8 + $0xbb0] sm:$0xff] }
 0x19a   :  { %2070 = vmatprep.subr.bf16.mxu0 %v2069_v5  ;;  %2190 = vmatprep.subr.bf16.mxu1 %v2189_v6  ;;  %v495_v5 = vld [vmem:[#allocation8 + $0x290] sm:$0xff]  ;;  %v716_v6 = vld [vmem:[#allocation8 + $0x978] sm:$0xff]  ;;  %v2087_v9 = vpack.c.bf16 %v709_v63, %v703_v61  ;;  %v2221_v61 = vpack.c.bf16 %v544_v53, %v538_v52  ;;  %v537_v63 = vld [vmem:[#allocation8 + $0x3e0] sm:$0xff] }
 0x19b   :  { %v2207_v10 = vpack.c.bf16 %v495_v5, %v489_v4  ;;  %v770_v4 = vld [vmem:[#allocation8 + $0xb28] sm:$0xff] }
 0x19c   :  { %v550_v5 = vld [vmem:[#allocation8 + $0x448] sm:$0xff] }
 0x19d   :  { %2072 = vmatpush1.bf16.msra.mxu0 %v2071_v13  ;;  %2192 = vmatpush1.bf16.msra.mxu1 %v2191_v14  ;;  %v721_v13 = vld [vmem:[#allocation8 + $0x9a0] sm:$0xff]  ;;  %v2089_v14 = vpack.c.bf16 %v722_v7, %v716_v6  ;;  %v556_v6 = vld [vmem:[#allocation8 + $0x478] sm:$0xff] }
 0x19e   :  { %2074 = vmatprep.subr.bf16.mxu0 %v2073_v18  ;;  %2194 = vmatprep.subr.bf16.mxu1 %v2193_v15  ;;  %v507_v18 = vld [vmem:[#allocation8 + $0x2f0] sm:$0xff]  ;;  %v728_v15 = vld [vmem:[#allocation8 + $0x9d8] sm:$0xff]  ;;  %v2091_v24 = vpack.c.bf16 %v721_v13, %v715_v12  ;;  %v2225_v12 = vpack.c.bf16 %v556_v6, %v550_v5  ;;  %v549_v13 = vld [vmem:[#allocation8 + $0x440] sm:$0xff] }
 0x19f   :  { %v2211_v25 = vpack.c.bf16 %v507_v18, %v501_v17  ;;  %v782_v17 = vld [vmem:[#allocation8 + $0xb88] sm:$0xff] }
 0x1a0   :  { %v562_v18 = vld [vmem:[#allocation8 + $0x4a8] sm:$0xff] }
 0x1a1   :  { %2076 = vmatpush1.bf16.msra.mxu0 %v2075_v28  ;;  %2196 = vmatpush1.bf16.msra.mxu1 %v2195_v29  ;;  %v733_v28 = vld [vmem:[#allocation8 + $0xa00] sm:$0xff]  ;;  %v2093_v29 = vpack.c.bf16 %v734_v19, %v728_v15  ;;  %v568_v15 = vld [vmem:[#allocation8 + $0x4d8] sm:$0xff] }
 0x1a2   :  { %2078 = vmatprep.subr.bf16.mxu0 %v2077_v31  ;;  %2198 = vmatprep.subr.bf16.mxu1 %v2197_v32  ;;  %v519_v31 = vld [vmem:[#allocation8 + $0x350] sm:$0xff]  ;;  %v740_v32 = vld [vmem:[#allocation8 + $0xa38] sm:$0xff]  ;;  %v2095_v36 = vpack.c.bf16 %v733_v28, %v727_v26  ;;  %v2229_v26 = vpack.c.bf16 %v568_v15, %v562_v18  ;;  %v561_v28 = vld [vmem:[#allocation8 + $0x4a0] sm:$0xff] }
 0x1a3   :  { %v2215_v37 = vpack.c.bf16 %v519_v31, %v513_v20  ;;  %v794_v20 = vld [vmem:[#allocation8 + $0xbe8] sm:$0xff] }
 0x1a4   :  { %v574_v31 = vld [vmem:[#allocation8 + $0x508] sm:$0xff] }
 0x1a5   :  { %2080 = vmatpush1.bf16.msra.mxu0 %v2079_v39  ;;  %2200 = vmatpush1.bf16.msra.mxu1 %v2199_v43  ;;  %v745_v39 = vld [vmem:[#allocation8 + $0xa60] sm:$0xff]  ;;  %v2097_v43 = vpack.c.bf16 %v746_v33, %v740_v32  ;;  %v580_v32 = vld [vmem:[#allocation8 + $0x538] sm:$0xff] }
 0x1a6   :  { %2082 = vmatprep.subr.bf16.mxu0 %v2081_v49  ;;  %2202 = vmatprep.subr.bf16.mxu1 %v2201_v50  ;;  %v531_v49 = vld [vmem:[#allocation8 + $0x3b0] sm:$0xff]  ;;  %v752_v50 = vld [vmem:[#allocation8 + $0xa98] sm:$0xff]  ;;  %v2099_v55 = vpack.c.bf16 %v745_v39, %v739_v38  ;;  %v2233_v38 = vpack.c.bf16 %v580_v32, %v574_v31  ;;  %v573_v39 = vld [vmem:[#allocation8 + $0x500] sm:$0xff] }
 0x1a7   :  { %v2219_v57 = vpack.c.bf16 %v531_v49, %v525_v47  ;;  %v806_v47 = vld [vmem:[#allocation8 + $0xc48] sm:$0xff]  ;;  %v835_v32 = vld [vmem:[#allocation8 + $0xd30] sm:$0xff] }
 0x1a8   :  { %v586_v49 = vld [vmem:[#allocation8 + $0x568] sm:$0xff] }
 0x1a9   :  { %2084 = vmatpush1.bf16.msra.mxu0 %v2083_v59  ;;  %2204 = vmatpush1.bf16.msra.mxu1 %v2203_v60  ;;  %v757_v59 = vld [vmem:[#allocation8 + $0xac0] sm:$0xff]  ;;  %v2101_v60 = vpack.c.bf16 %v758_v51, %v752_v50  ;;  %v592_v50 = vld [vmem:[#allocation8 + $0x598] sm:$0xff] }
 0x1aa   :  { %2086 = vmatprep.subr.bf16.mxu0 %v2085_v2  ;;  %2206 = vmatprep.subr.bf16.mxu1 %v2205_v3  ;;  %v543_v2 = vld [vmem:[#allocation8 + $0x410] sm:$0xff]  ;;  %v764_v3 = vld [vmem:[#allocation8 + $0xaf8] sm:$0xff]  ;;  %v2103_v7 = vpack.c.bf16 %v757_v59, %v751_v58  ;;  %v805_v58 = vld [vmem:[#allocation8 + $0xc40] sm:$0xff] }
 0x1ab   :  { %v2223_v8 = vpack.c.bf16 %v543_v2, %v537_v63  ;;  %v585_v59 = vld [vmem:[#allocation8 + $0x560] sm:$0xff]  ;;  %v818_v63 = vld [vmem:[#allocation8 + $0xca8] sm:$0xff] }
 0x1ac   :  { %v598_v2 = vld [vmem:[#allocation8 + $0x5c8] sm:$0xff] }
 0x1ad   :  { %2088 = vmatpush1.bf16.msra.mxu0 %v2087_v9  ;;  %2208 = vmatpush1.bf16.msra.mxu1 %v2207_v10  ;;  %v769_v9 = vld [vmem:[#allocation8 + $0xb20] sm:$0xff]  ;;  %v2105_v10 = vpack.c.bf16 %v770_v4, %v764_v3  ;;  %v604_v3 = vld [vmem:[#allocation8 + $0x5f8] sm:$0xff] }
 0x1ae   :  { %2090 = vmatprep.subr.bf16.mxu0 %v2089_v14  ;;  %2210 = vmatprep.subr.bf16.mxu1 %v2209_v16  ;;  %v555_v14 = vld [vmem:[#allocation8 + $0x470] sm:$0xff]  ;;  %v776_v16 = vld [vmem:[#allocation8 + $0xb58] sm:$0xff]  ;;  %v2107_v19 = vpack.c.bf16 %v769_v9, %v763_v0  ;;  %v597_v0 = vld [vmem:[#allocation8 + $0x5c0] sm:$0xff]  ;;  %v2241_v9 = vpack.c.bf16 %v604_v3, %v598_v2 }
 0x1af   :  { %v2227_v21 = vpack.c.bf16 %v555_v14, %v549_v13  ;;  %v830_v13 = vld [vmem:[#allocation8 + $0xd08] sm:$0xff]  ;;  %v865_v3 = vld [vmem:[#allocation8 + $0xe20] sm:$0xff] }
 0x1b0   :  { %v610_v14 = vld [vmem:[#allocation8 + $0x628] sm:$0xff] }
 0x1b1   :  { %2092 = vmatpush1.bf16.msra.mxu0 %v2091_v24  ;;  %2212 = vmatpush1.bf16.msra.mxu1 %v2211_v25  ;;  %v781_v24 = vld [vmem:[#allocation8 + $0xb80] sm:$0xff]  ;;  %v2109_v25 = vpack.c.bf16 %v782_v17, %v776_v16  ;;  %v616_v16 = vld [vmem:[#allocation8 + $0x658] sm:$0xff] }
 0x1b2   :  { %2094 = vmatprep.subr.bf16.mxu0 %v2093_v29  ;;  %2214 = vmatprep.subr.bf16.mxu1 %v2213_v30  ;;  %v567_v29 = vld [vmem:[#allocation8 + $0x4d0] sm:$0xff]  ;;  %v788_v30 = vld [vmem:[#allocation8 + $0xbb8] sm:$0xff]  ;;  %v2111_v33 = vpack.c.bf16 %v781_v24, %v775_v23  ;;  %v2245_v23 = vpack.c.bf16 %v616_v16, %v610_v14  ;;  %v609_v24 = vld [vmem:[#allocation8 + $0x620] sm:$0xff] }
 0x1b3   :  { %v2231_v34 = vpack.c.bf16 %v567_v29, %v561_v28  ;;  %v842_v28 = vld [vmem:[#allocation8 + $0xd68] sm:$0xff]  ;;  %v871_v14 = vld [vmem:[#allocation8 + $0xe50] sm:$0xff]  ;;  %v877_v16 = vld [vmem:[#allocation8 + $0xe80] sm:$0xff] }
 0x1b4   :  { %v622_v29 = vld [vmem:[#allocation8 + $0x688] sm:$0xff] }
 0x1b5   :  { %2096 = vmatpush1.bf16.msra.mxu0 %v2095_v36  ;;  %2216 = vmatpush1.bf16.msra.mxu1 %v2215_v37  ;;  %v793_v36 = vld [vmem:[#allocation8 + $0xbe0] sm:$0xff]  ;;  %v2113_v37 = vpack.c.bf16 %v794_v20, %v788_v30  ;;  %v628_v30 = vld [vmem:[#allocation8 + $0x6b8] sm:$0xff] }
 0x1b6   :  { %2098 = vmatprep.subr.bf16.mxu0 %v2097_v43  ;;  %2218 = vmatprep.subr.bf16.mxu1 %v2217_v44  ;;  %v579_v43 = vld [vmem:[#allocation8 + $0x530] sm:$0xff]  ;;  %v800_v44 = vld [vmem:[#allocation8 + $0xc18] sm:$0xff]  ;;  %v2115_v51 = vpack.c.bf16 %v793_v36, %v787_v35  ;;  %v2249_v36 = vpack.c.bf16 %v628_v30, %v622_v29  ;;  %v889_v30 = vld [vmem:[#allocation8 + $0xee0] sm:$0xff] }
 0x1b7   :  { %v2235_v52 = vpack.c.bf16 %v579_v43, %v573_v39  ;;  %v2117_v53 = vpack.c.bf16 %v806_v47, %v800_v44  ;;  %v854_v39 = vld [vmem:[#allocation8 + $0xdc8] sm:$0xff]  ;;  %v640_v44 = vld [vmem:[#allocation8 + $0x718] sm:$0xff]  ;;  %v883_v29 = vld [vmem:[#allocation8 + $0xeb0] sm:$0xff] }
 0x1b8   :  { %v634_v43 = vld [vmem:[#allocation8 + $0x6e8] sm:$0xff] }
 0x1b9   :  { %2100 = vmatpush1.bf16.msra.mxu0 %v2099_v55  ;;  %2220 = vmatpush1.bf16.msra.mxu1 %v2219_v57  ;;  %v2237_v55 = vpack.c.bf16 %v592_v50, %v586_v49  ;;  %v799_v57 = vld [vmem:[#allocation8 + $0xc10] sm:$0xff] }
 0x1ba   :  { %2102 = vmatprep.subr.bf16.mxu0 %v2101_v60  ;;  %2222 = vmatprep.subr.bf16.mxu1 %v2221_v61  ;;  %v591_v60 = vld [vmem:[#allocation8 + $0x590] sm:$0xff]  ;;  %v812_v61 = vld [vmem:[#allocation8 + $0xc78] sm:$0xff]  ;;  %v2119_v4 = vpack.c.bf16 %v805_v58, %v799_v57 }
 0x1bb   :  { %v2239_v5 = vpack.c.bf16 %v591_v60, %v585_v59  ;;  %v2121_v6 = vpack.c.bf16 %v818_v63, %v812_v61  ;;  %v639_v57 = vld [vmem:[#allocation8 + $0x710] sm:$0xff]  ;;  %v860_v58 = vld [vmem:[#allocation8 + $0xdf8] sm:$0xff]  ;;  %v866_v59 = vld [vmem:[#allocation8 + $0xe28] sm:$0xff] }
 0x1bc   :  { %v646_v60 = vld [vmem:[#allocation8 + $0x748] sm:$0xff]  ;;  %v652_v61 = vld [vmem:[#allocation8 + $0x778] sm:$0xff]  ;;  %v2137_v2 = vpack.c.bf16 %v866_v59, %v860_v58 }
 0x1bd   :  { %2104 = vmatpush1.bf16.msra.mxu0 %v2103_v7  ;;  %2224 = vmatpush1.bf16.msra.mxu1 %v2223_v8  ;;  %v811_v7 = vld [vmem:[#allocation8 + $0xc70] sm:$0xff]  ;;  %v817_v8 = vld [vmem:[#allocation8 + $0xca0] sm:$0xff] }
 0x1be   :  { %2106 = vmatprep.subr.bf16.mxu0 %v2105_v10  ;;  %2226 = vmatprep.subr.bf16.mxu1 %v2225_v12  ;;  %v603_v10 = vld [vmem:[#allocation8 + $0x5f0] sm:$0xff]  ;;  %v824_v12 = vld [vmem:[#allocation8 + $0xcd8] sm:$0xff]  ;;  %v2123_v17 = vpack.c.bf16 %v817_v8, %v811_v7  ;;  %v878_v8 = vld [vmem:[#allocation8 + $0xe88] sm:$0xff] }
 0x1bf   :  { %v2243_v18 = vpack.c.bf16 %v603_v10, %v597_v0  ;;  %v2125_v15 = vpack.c.bf16 %v830_v13, %v824_v12  ;;  %v872_v7 = vld [vmem:[#allocation8 + $0xe58] sm:$0xff]  ;;  %v658_v0 = vld [vmem:[#allocation8 + $0x7a8] sm:$0xff] }
 0x1c0   :  { %v2141_v13 = vpack.c.bf16 %v878_v8, %v872_v7 }
 0x1c1   :  { %2108 = vmatpush1.bf16.msra.mxu0 %v2107_v19  ;;  %2228 = vmatpush1.bf16.msra.mxu1 %v2227_v21  ;;  %v823_v19 = vld [vmem:[#allocation8 + $0xcd0] sm:$0xff]  ;;  %v829_v21 = vld [vmem:[#allocation8 + $0xd00] sm:$0xff] }
 0x1c2   :  { %2110 = vmatprep.subr.bf16.mxu0 %v2109_v25  ;;  %2230 = vmatprep.subr.bf16.mxu1 %v2229_v26  ;;  %v615_v25 = vld [vmem:[#allocation8 + $0x650] sm:$0xff]  ;;  %v836_v26 = vld [vmem:[#allocation8 + $0xd38] sm:$0xff]  ;;  %v2127_v20 = vpack.c.bf16 %v829_v21, %v823_v19  ;;  %v890_v21 = vld [vmem:[#allocation8 + $0xee8] sm:$0xff] }
 0x1c3   :  { %v2247_v31 = vpack.c.bf16 %v615_v25, %v609_v24  ;;  %v2129_v35 = vpack.c.bf16 %v842_v28, %v836_v26  ;;  %v884_v19 = vld [vmem:[#allocation8 + $0xeb8] sm:$0xff]  ;;  %v2143_v25 = vpack.c.bf16 %v877_v16, %v871_v14  ;;  %v938_v16 = vld [vmem:[#allocation8 + $0x1068] sm:$0xff] }
 0x1c4   :  { %v676_v24 = vld [vmem:[#allocation8 + $0x838] sm:$0xff]  ;;  %v2145_v28 = vpack.c.bf16 %v890_v21, %v884_v19 }
 0x1c5   :  { %2112 = vmatpush1.bf16.msra.mxu0 %v2111_v33  ;;  %2232 = vmatpush1.bf16.msra.mxu1 %v2231_v34  ;;  %v841_v33 = vld [vmem:[#allocation8 + $0xd60] sm:$0xff]  ;;  %v932_v14 = vld [vmem:[#allocation8 + $0x1038] sm:$0xff] }
 0x1c6   :  { %2114 = vmatprep.subr.bf16.mxu0 %v2113_v37  ;;  %2234 = vmatprep.subr.bf16.mxu1 %v2233_v38  ;;  %v621_v34 = vld [vmem:[#allocation8 + $0x680] sm:$0xff]  ;;  %v627_v37 = vld [vmem:[#allocation8 + $0x6b0] sm:$0xff]  ;;  %v848_v38 = vld [vmem:[#allocation8 + $0xd98] sm:$0xff]  ;;  %v2131_v47 = vpack.c.bf16 %v841_v33, %v835_v32  ;;  %v2161_v21 = vpack.c.bf16 %v938_v16, %v932_v14 }
 0x1c7   :  { %v2251_v49 = vpack.c.bf16 %v627_v37, %v621_v34  ;;  %v2133_v50 = vpack.c.bf16 %v854_v39, %v848_v38  ;;  %v675_v32 = vld [vmem:[#allocation8 + $0x830] sm:$0xff]  ;;  %v896_v33 = vld [vmem:[#allocation8 + $0xf18] sm:$0xff]  ;;  %v902_v34 = vld [vmem:[#allocation8 + $0xf48] sm:$0xff]  ;;  %v2147_v37 = vpack.c.bf16 %v889_v30, %v883_v29 }
 0x1c8   :  { %v2149_v39 = vpack.c.bf16 %v902_v34, %v896_v33  ;;  %v944_v29 = vld [vmem:[#allocation8 + $0x1098] sm:$0xff]  ;;  %v950_v30 = vld [vmem:[#allocation8 + $0x10c8] sm:$0xff] }
 0x1c9   :  { %2116 = vmatpush1.bf16.msra.mxu0 %v2115_v51  ;;  %2236 = vmatpush1.bf16.msra.mxu1 %v2235_v52  ;;  %v847_v51 = vld [vmem:[#allocation8 + $0xd90] sm:$0xff]  ;;  %v853_v52 = vld [vmem:[#allocation8 + $0xdc0] sm:$0xff]  ;;  %v2165_v34 = vpack.c.bf16 %v950_v30, %v944_v29 }
 0x1ca   :  { %2118 = vmatprep.subr.bf16.mxu0 %v2117_v53  ;;  %2238 = vmatprep.subr.bf16.mxu1 %v2237_v55  ;;  %v633_v53 = vld [vmem:[#allocation8 + $0x6e0] sm:$0xff]  ;;  %v2253_v55 = vpack.c.bf16 %v640_v44, %v634_v43  ;;  %v895_v43 = vld [vmem:[#allocation8 + $0xf10] sm:$0xff] }
 0x1cb   :  { %v2255_v63 = vpack.c.bf16 %v639_v57, %v633_v53  ;;  %v901_v44 = vld [vmem:[#allocation8 + $0xf40] sm:$0xff]  ;;  %v694_v53 = vld [vmem:[#allocation8 + $0x8c8] sm:$0xff]  ;;  %v783_v30 = vld [vmem:[#allocation8 + $0xb90] sm:$0xff] }
 0x1cc   :  { %1370 = vmatmul.mubr.f32.vlgmr.msra.gmra.mrb[8].mxu0 %v2746_v40  ;;  %v2151_v57 = vpack.c.bf16 %v901_v44, %v895_v43  ;;  %v956_v43 = vld [vmem:[#allocation8 + $0x10f8] sm:$0xff]  ;;  %v962_v44 = vld [vmem:[#allocation8 + $0x1128] sm:$0xff]  ;;  %v777_v29 = vld [vmem:[#allocation8 + $0xb60] sm:$0xff] }
 0x1cd   :  { %2120 = vmatpush1.bf16.msra.mxu0 %v2119_v4  ;;  %1440 = vmatprep.mubr.f32.mxu0 %v2763_v27  ;;  %v645_v4 = vld [vmem:[#allocation8 + $0x740] sm:$0xff] }
 0x1ce   :  { %2240 = vmatpush1.bf16.msra.mxu1 %v2239_v5  ;;  %2122 = vmatprep.subr.bf16.mxu0 %v2121_v6  ;;  %v2257_v5 = vpack.c.bf16 %v652_v61, %v646_v60  ;;  %v651_v6 = vld [vmem:[#allocation8 + $0x770] sm:$0xff]  ;;  %v913_v61 = vld [vmem:[#allocation8 + $0xfa0] sm:$0xff] }
 0x1cf   :  { %2242 = vmatprep.subr.bf16.mxu1 %v2241_v9  ;;  %v664_v9 = vld [vmem:[#allocation8 + $0x7d8] sm:$0xff]  ;;  %v2259_v12 = vpack.c.bf16 %v651_v6, %v645_v4  ;;  %v907_v60 = vld [vmem:[#allocation8 + $0xf70] sm:$0xff]  ;;  %v706_v4 = vld [vmem:[#allocation8 + $0x928] sm:$0xff] }
 0x1d0   :  { %v2155_v6 = vpack.c.bf16 %v913_v61, %v907_v60  ;;  %v968_v60 = vld [vmem:[#allocation8 + $0x1158] sm:$0xff]  ;;  %v974_v61 = vld [vmem:[#allocation8 + $0x1188] sm:$0xff] }
 0x1d1   :  { %2124 = vmatpush1.bf16.msra.mxu0 %v2123_v17  ;;  %v657_v17 = vld [vmem:[#allocation8 + $0x7a0] sm:$0xff] }
 0x1d2   :  { %2244 = vmatpush1.bf16.msra.mxu1 %v2243_v18  ;;  %2126 = vmatprep.subr.bf16.mxu0 %v2125_v15  ;;  %v2261_v18 = vpack.c.bf16 %v664_v9, %v658_v0  ;;  %v663_v15 = vld [vmem:[#allocation8 + $0x7d0] sm:$0xff]  ;;  %v925_v9 = vld [vmem:[#allocation8 + $0x1000] sm:$0xff] }
 0x1d3   :  { %2246 = vmatprep.subr.bf16.mxu1 %v2245_v23  ;;  %v670_v23 = vld [vmem:[#allocation8 + $0x808] sm:$0xff]  ;;  %v2263_v26 = vpack.c.bf16 %v663_v15, %v657_v17  ;;  %v919_v0 = vld [vmem:[#allocation8 + $0xfd0] sm:$0xff] }
 0x1d4   :  { %v718_v17 = vld [vmem:[#allocation8 + $0x988] sm:$0xff]  ;;  %v2159_v15 = vpack.c.bf16 %v925_v9, %v919_v0  ;;  %v980_v0 = vld [vmem:[#allocation8 + $0x11b8] sm:$0xff] }
 0x1d5   :  { %1512 = vmatmul.mubr.f32.vlgmr.msra.gmra.mrb[2].mxu1 %v2739_v11  ;;  %2128 = vmatpush1.bf16.msra.mxu0 %v2127_v20  ;;  %v2135_v11 = vpack.c.bf16 %v853_v52, %v847_v51  ;;  %v669_v20 = vld [vmem:[#allocation8 + $0x800] sm:$0xff]  ;;  %v908_v51 = vld [vmem:[#allocation8 + $0xf78] sm:$0xff]  ;;  %v914_v52 = vld [vmem:[#allocation8 + $0xfa8] sm:$0xff] }
 0x1d6   :  { %2248 = vmatpush1.bf16.msra.mxu1 %v2247_v31  ;;  %1582 = vmatprep.mubr.f32.mxu1 %v2751_v42  ;;  %v859_v42 = vld [vmem:[#allocation8 + $0xdf0] sm:$0xff]  ;;  %v2265_v31 = vpack.c.bf16 %v676_v24, %v670_v23  ;;  %v2267_v38 = vpack.c.bf16 %v675_v32, %v669_v20  ;;  %v2153_v59 = vpack.c.bf16 %v914_v52, %v908_v51  ;;  %v937_v24 = vld [vmem:[#allocation8 + $0x1060] sm:$0xff]  ;;  %v730_v20 = vld [vmem:[#allocation8 + $0x9e8] sm:$0xff] }
 0x1d7   :  { %2130 = vmatprep.subr.bf16.mxu0 %v2129_v35  ;;  %2250 = vmatprep.subr.bf16.mxu1 %v2249_v36  ;;  %v2139_v10 = vpack.c.bf16 %v865_v3, %v859_v42  ;;  %v682_v35 = vld [vmem:[#allocation8 + $0x868] sm:$0xff]  ;;  %v688_v36 = vld [vmem:[#allocation8 + $0x898] sm:$0xff]  ;;  %v931_v23 = vld [vmem:[#allocation8 + $0x1030] sm:$0xff]  ;;  %v2169_v52 = vpack.c.bf16 %v962_v44, %v956_v43 }
 0x1d8   :  { %v920_v42 = vld [vmem:[#allocation8 + $0xfd8] sm:$0xff]  ;;  %v926_v3 = vld [vmem:[#allocation8 + $0x1008] sm:$0xff]  ;;  %v2163_v32 = vpack.c.bf16 %v937_v24, %v931_v23  ;;  %v801_v43 = vld [vmem:[#allocation8 + $0xc20] sm:$0xff] }
 0x1d9   :  { %2132 = vmatpush1.bf16.msra.mxu0 %v2131_v47  ;;  %v681_v47 = vld [vmem:[#allocation8 + $0x860] sm:$0xff]  ;;  %v2157_v8 = vpack.c.bf16 %v926_v3, %v920_v42  ;;  %v2173_v3 = vpack.c.bf16 %v974_v61, %v968_v60  ;;  %v986_v9 = vld [vmem:[#allocation8 + $0x11e8] sm:$0xff]  ;;  %v784_v24 = vld [vmem:[#allocation8 + $0xb98] sm:$0xff] }
 0x1da   :  { %2252 = vmatpush1.bf16.msra.mxu1 %v2251_v49  ;;  %2134 = vmatprep.subr.bf16.mxu0 %v2133_v50  ;;  %v2269_v49 = vpack.c.bf16 %v688_v36, %v682_v35  ;;  %v687_v50 = vld [vmem:[#allocation8 + $0x890] sm:$0xff]  ;;  %v949_v36 = vld [vmem:[#allocation8 + $0x10c0] sm:$0xff]  ;;  %v2177_v16 = vpack.c.bf16 %v986_v9, %v980_v0  ;;  %v778_v23 = vld [vmem:[#allocation8 + $0xb68] sm:$0xff] }
 0x1db   :  { %2254 = vmatprep.subr.bf16.mxu1 %v2253_v55  ;;  %v700_v55 = vld [vmem:[#allocation8 + $0x8f8] sm:$0xff]  ;;  %v2271_v58 = vpack.c.bf16 %v687_v50, %v681_v47  ;;  %v943_v35 = vld [vmem:[#allocation8 + $0x1090] sm:$0xff]  ;;  %v742_v47 = vld [vmem:[#allocation8 + $0xa48] sm:$0xff] }
 0x1dc   :  { %v2167_v50 = vpack.c.bf16 %v949_v36, %v943_v35  ;;  %v795_v35 = vld [vmem:[#allocation8 + $0xbf0] sm:$0xff]  ;;  %v802_v36 = vld [vmem:[#allocation8 + $0xc28] sm:$0xff]  ;;  %v825_v60 = vld [vmem:[#allocation8 + $0xce0] sm:$0xff] }
 0x1dd   :  { %2136 = vmatpush1.bf16.msra.mxu0 %v2135_v11  ;;  %v693_v11 = vld [vmem:[#allocation8 + $0x8c0] sm:$0xff]  ;;  %v807_v44 = vld [vmem:[#allocation8 + $0xc50] sm:$0xff] }
 0x1de   :  { %2256 = vmatpush1.bf16.msra.mxu1 %v2255_v63  ;;  %2138 = vmatprep.subr.bf16.mxu0 %v2137_v2  ;;  %v2273_v63 = vpack.c.bf16 %v700_v55, %v694_v53  ;;  %v699_v2 = vld [vmem:[#allocation8 + $0x8f0] sm:$0xff]  ;;  %v961_v55 = vld [vmem:[#allocation8 + $0x1120] sm:$0xff] }
 0x1df   :  { %2258 = vmatprep.subr.bf16.mxu1 %v2257_v5  ;;  %v712_v5 = vld [vmem:[#allocation8 + $0x958] sm:$0xff]  ;;  %v2275_v7 = vpack.c.bf16 %v699_v2, %v693_v11  ;;  %v955_v53 = vld [vmem:[#allocation8 + $0x10f0] sm:$0xff]  ;;  %v754_v11 = vld [vmem:[#allocation8 + $0xaa8] sm:$0xff] }
 0x1e0   :  { %v2171_v2 = vpack.c.bf16 %v961_v55, %v955_v53  ;;  %v819_v53 = vld [vmem:[#allocation8 + $0xcb0] sm:$0xff]  ;;  %v826_v55 = vld [vmem:[#allocation8 + $0xce8] sm:$0xff] }
 0x1e1   :  { %2140 = vmatpush1.bf16.msra.mxu0 %v2139_v10  ;;  %v705_v10 = vld [vmem:[#allocation8 + $0x920] sm:$0xff]  ;;  %v831_v61 = vld [vmem:[#allocation8 + $0xd10] sm:$0xff] }
 0x1e2   :  { %2260 = vmatpush1.bf16.msra.mxu1 %v2259_v12  ;;  %2142 = vmatprep.subr.bf16.mxu0 %v2141_v13  ;;  %v2277_v12 = vpack.c.bf16 %v712_v5, %v706_v4  ;;  %v711_v13 = vld [vmem:[#allocation8 + $0x950] sm:$0xff]  ;;  %v973_v5 = vld [vmem:[#allocation8 + $0x1180] sm:$0xff] }
 0x1e3   :  { %2262 = vmatprep.subr.bf16.mxu1 %v2261_v18  ;;  %v724_v18 = vld [vmem:[#allocation8 + $0x9b8] sm:$0xff]  ;;  %v2279_v19 = vpack.c.bf16 %v711_v13, %v705_v10  ;;  %v967_v4 = vld [vmem:[#allocation8 + $0x1150] sm:$0xff]  ;;  %v766_v10 = vld [vmem:[#allocation8 + $0xb08] sm:$0xff] }
 0x1e4   :  { %v2175_v13 = vpack.c.bf16 %v973_v5, %v967_v4  ;;  %v843_v4 = vld [vmem:[#allocation8 + $0xd70] sm:$0xff]  ;;  %v850_v5 = vld [vmem:[#allocation8 + $0xda8] sm:$0xff] }
 0x1e5   :  { %2144 = vmatpush1.bf16.msra.mxu0 %v2143_v25  ;;  %v717_v25 = vld [vmem:[#allocation8 + $0x980] sm:$0xff]  ;;  %v855_v0 = vld [vmem:[#allocation8 + $0xdd0] sm:$0xff] }
 0x1e6   :  { %2264 = vmatpush1.bf16.msra.mxu1 %v2263_v26  ;;  %2146 = vmatprep.subr.bf16.mxu0 %v2145_v28  ;;  %v2281_v26 = vpack.c.bf16 %v724_v18, %v718_v17  ;;  %v723_v28 = vld [vmem:[#allocation8 + $0x9b0] sm:$0xff]  ;;  %v985_v18 = vld [vmem:[#allocation8 + $0x11e0] sm:$0xff] }
 0x1e7   :  { %2266 = vmatprep.subr.bf16.mxu1 %v2265_v31  ;;  %v736_v31 = vld [vmem:[#allocation8 + $0xa18] sm:$0xff]  ;;  %v2283_v33 = vpack.c.bf16 %v723_v28, %v717_v25  ;;  %v979_v17 = vld [vmem:[#allocation8 + $0x11b0] sm:$0xff]  ;;  %v2301_v28 = vpack.c.bf16 %v784_v24, %v778_v23  ;;  %v873_v23 = vld [vmem:[#allocation8 + $0xe60] sm:$0xff] }
 0x1e8   :  { %v2179_v25 = vpack.c.bf16 %v985_v18, %v979_v17  ;;  %v867_v17 = vld [vmem:[#allocation8 + $0xe30] sm:$0xff]  ;;  %v874_v18 = vld [vmem:[#allocation8 + $0xe68] sm:$0xff] }
 0x1e9   :  { %2148 = vmatpush1.bf16.msra.mxu0 %v2147_v37  ;;  %v729_v37 = vld [vmem:[#allocation8 + $0x9e0] sm:$0xff]  ;;  %v879_v24 = vld [vmem:[#allocation8 + $0xe90] sm:$0xff] }
 0x1ea   :  { %2268 = vmatpush1.bf16.msra.mxu1 %v2267_v38  ;;  %2150 = vmatprep.subr.bf16.mxu0 %v2149_v39  ;;  %v2285_v38 = vpack.c.bf16 %v736_v31, %v730_v20  ;;  %v735_v39 = vld [vmem:[#allocation8 + $0xa10] sm:$0xff]  ;;  %v790_v20 = vld [vmem:[#allocation8 + $0xbc8] sm:$0xff]  ;;  %v796_v31 = vld [vmem:[#allocation8 + $0xbf8] sm:$0xff] }
 0x1eb   :  { %2270 = vmatprep.subr.bf16.mxu1 %v2269_v49  ;;  %v748_v49 = vld [vmem:[#allocation8 + $0xa78] sm:$0xff]  ;;  %v2287_v51 = vpack.c.bf16 %v735_v39, %v729_v37 }
 0x1ec   :  { %v808_v37 = vld [vmem:[#allocation8 + $0xc58] sm:$0xff] }
 0x1ed   :  { %2152 = vmatpush1.bf16.msra.mxu0 %v2151_v57  ;;  %v741_v57 = vld [vmem:[#allocation8 + $0xa40] sm:$0xff]  ;;  %v2309_v39 = vpack.c.bf16 %v808_v37, %v802_v36  ;;  %v903_v36 = vld [vmem:[#allocation8 + $0xf50] sm:$0xff]  ;;  %v910_v37 = vld [vmem:[#allocation8 + $0xf88] sm:$0xff] }
 0x1ee   :  { %2272 = vmatpush1.bf16.msra.mxu1 %v2271_v58  ;;  %2154 = vmatprep.subr.bf16.mxu0 %v2153_v59  ;;  %v2289_v58 = vpack.c.bf16 %v748_v49, %v742_v47  ;;  %v747_v59 = vld [vmem:[#allocation8 + $0xa70] sm:$0xff]  ;;  %v814_v47 = vld [vmem:[#allocation8 + $0xc88] sm:$0xff]  ;;  %v820_v49 = vld [vmem:[#allocation8 + $0xcb8] sm:$0xff] }
 0x1ef   :  { %2274 = vmatprep.subr.bf16.mxu1 %v2273_v63  ;;  %v760_v63 = vld [vmem:[#allocation8 + $0xad8] sm:$0xff]  ;;  %v2291_v42 = vpack.c.bf16 %v747_v59, %v741_v57 }
 0x1f0   :  { %v832_v57 = vld [vmem:[#allocation8 + $0xd18] sm:$0xff] }
 0x1f1   :  { %2156 = vmatpush1.bf16.msra.mxu0 %v2155_v6  ;;  %v753_v6 = vld [vmem:[#allocation8 + $0xaa0] sm:$0xff]  ;;  %v2317_v59 = vpack.c.bf16 %v832_v57, %v826_v55  ;;  %v927_v55 = vld [vmem:[#allocation8 + $0x1010] sm:$0xff]  ;;  %v934_v57 = vld [vmem:[#allocation8 + $0x1048] sm:$0xff] }
 0x1f2   :  { %2276 = vmatpush1.bf16.msra.mxu1 %v2275_v7  ;;  %2158 = vmatprep.subr.bf16.mxu0 %v2157_v8  ;;  %v2293_v7 = vpack.c.bf16 %v760_v63, %v754_v11  ;;  %v759_v8 = vld [vmem:[#allocation8 + $0xad0] sm:$0xff]  ;;  %v838_v11 = vld [vmem:[#allocation8 + $0xd48] sm:$0xff]  ;;  %v844_v63 = vld [vmem:[#allocation8 + $0xd78] sm:$0xff] }
 0x1f3   :  { %2278 = vmatprep.subr.bf16.mxu1 %v2277_v12  ;;  %v772_v12 = vld [vmem:[#allocation8 + $0xb38] sm:$0xff]  ;;  %v2295_v14 = vpack.c.bf16 %v759_v8, %v753_v6  ;;  %v849_v8 = vld [vmem:[#allocation8 + $0xda0] sm:$0xff] }
 0x1f4   :  { %v856_v6 = vld [vmem:[#allocation8 + $0xdd8] sm:$0xff] }
 0x1f5   :  { %2160 = vmatpush1.bf16.msra.mxu0 %v2159_v15  ;;  %v2297_v15 = vpack.c.bf16 %v772_v12, %v766_v10  ;;  %v862_v10 = vld [vmem:[#allocation8 + $0xe08] sm:$0xff]  ;;  %v868_v12 = vld [vmem:[#allocation8 + $0xe38] sm:$0xff] }
 0x1f6   :  { %2280 = vmatpush1.bf16.msra.mxu1 %v2279_v19  ;;  %2162 = vmatprep.subr.bf16.mxu0 %v2161_v21  ;;  %v765_v19 = vld [vmem:[#allocation8 + $0xb00] sm:$0xff]  ;;  %v771_v21 = vld [vmem:[#allocation8 + $0xb30] sm:$0xff] }
 0x1f7   :  { %2282 = vmatprep.subr.bf16.mxu1 %v2281_v26  ;;  %v2299_v26 = vpack.c.bf16 %v771_v21, %v765_v19 }
 0x1f9   :  { %2164 = vmatpush1.bf16.msra.mxu0 %v2163_v32  ;;  %v2303_v32 = vpack.c.bf16 %v783_v30, %v777_v29  ;;  %v885_v30 = vld [vmem:[#allocation8 + $0xec0] sm:$0xff] }
 0x1fa   :  { %2284 = vmatpush1.bf16.msra.mxu1 %v2283_v33  ;;  %2166 = vmatprep.subr.bf16.mxu0 %v2165_v34  ;;  %v2305_v33 = vpack.c.bf16 %v796_v31, %v790_v20  ;;  %v789_v34 = vld [vmem:[#allocation8 + $0xbc0] sm:$0xff]  ;;  %v891_v20 = vld [vmem:[#allocation8 + $0xef0] sm:$0xff]  ;;  %v898_v31 = vld [vmem:[#allocation8 + $0xf28] sm:$0xff] }
 0x1fb   :  { %2286 = vmatprep.subr.bf16.mxu1 %v2285_v38  ;;  %v2307_v38 = vpack.c.bf16 %v795_v35, %v789_v34  ;;  %v897_v35 = vld [vmem:[#allocation8 + $0xf20] sm:$0xff] }
 0x1fd   :  { %2168 = vmatpush1.bf16.msra.mxu0 %v2167_v50  ;;  %v2311_v50 = vpack.c.bf16 %v807_v44, %v801_v43  ;;  %v909_v44 = vld [vmem:[#allocation8 + $0xf80] sm:$0xff] }
 0x1fe   :  { %2288 = vmatpush1.bf16.msra.mxu1 %v2287_v51  ;;  %2170 = vmatprep.subr.bf16.mxu0 %v2169_v52  ;;  %v2313_v51 = vpack.c.bf16 %v820_v49, %v814_v47  ;;  %v813_v52 = vld [vmem:[#allocation8 + $0xc80] sm:$0xff]  ;;  %v915_v47 = vld [vmem:[#allocation8 + $0xfb0] sm:$0xff]  ;;  %v922_v49 = vld [vmem:[#allocation8 + $0xfe8] sm:$0xff] }
 0x1ff   :  { %2290 = vmatprep.subr.bf16.mxu1 %v2289_v58  ;;  %v2315_v58 = vpack.c.bf16 %v819_v53, %v813_v52  ;;  %v921_v53 = vld [vmem:[#allocation8 + $0xfe0] sm:$0xff] }
 0x201   :  { %2172 = vmatpush1.bf16.msra.mxu0 %v2171_v2  ;;  %v2319_v2 = vpack.c.bf16 %v831_v61, %v825_v60  ;;  %v933_v61 = vld [vmem:[#allocation8 + $0x1040] sm:$0xff] }
 0x202   :  { %2292 = vmatpush1.bf16.msra.mxu1 %v2291_v42  ;;  %2174 = vmatprep.subr.bf16.mxu0 %v2173_v3  ;;  %v2321_v42 = vpack.c.bf16 %v844_v63, %v838_v11  ;;  %v837_v3 = vld [vmem:[#allocation8 + $0xd40] sm:$0xff]  ;;  %v939_v11 = vld [vmem:[#allocation8 + $0x1070] sm:$0xff]  ;;  %v946_v63 = vld [vmem:[#allocation8 + $0x10a8] sm:$0xff] }
 0x203   :  { %2294 = vmatprep.subr.bf16.mxu1 %v2293_v7 }
 0x205   :  { %2176 = vmatpush1.bf16.msra.mxu0 %v2175_v13  ;;  %v2327_v13 = vpack.c.bf16 %v855_v0, %v849_v8  ;;  %v957_v0 = vld [vmem:[#allocation8 + $0x1100] sm:$0xff] }
 0x206   :  { %2296 = vmatpush1.bf16.msra.mxu1 %v2295_v14  ;;  %2178 = vmatprep.subr.bf16.mxu0 %v2177_v16  ;;  %v2329_v14 = vpack.c.bf16 %v868_v12, %v862_v10  ;;  %v861_v16 = vld [vmem:[#allocation8 + $0xe00] sm:$0xff]  ;;  %v963_v10 = vld [vmem:[#allocation8 + $0x1130] sm:$0xff]  ;;  %v970_v12 = vld [vmem:[#allocation8 + $0x1168] sm:$0xff] }
 0x207   :  { %2298 = vmatprep.subr.bf16.mxu1 %v2297_v15  ;;  %v880_v15 = vld [vmem:[#allocation8 + $0xe98] sm:$0xff]  ;;  %v2331_v19 = vpack.c.bf16 %v867_v17, %v861_v16  ;;  %v969_v17 = vld [vmem:[#allocation8 + $0x1160] sm:$0xff] }
 0x208   :  { %v2333_v21 = vpack.c.bf16 %v880_v15, %v874_v18  ;;  %v975_v18 = vld [vmem:[#allocation8 + $0x1190] sm:$0xff]  ;;  %v982_v15 = vld [vmem:[#allocation8 + $0x11c8] sm:$0xff] }
 0x209   :  { %2180 = vmatpush1.bf16.msra.mxu0 %v2179_v25  ;;  %v886_v25 = vld [vmem:[#allocation8 + $0xec8] sm:$0xff] }
 0x20a   :  { %2300 = vmatpush1.bf16.msra.mxu1 %v2299_v26  ;;  %v892_v26 = vld [vmem:[#allocation8 + $0xef8] sm:$0xff] }
 0x20b   :  { %2302 = vmatprep.subr.bf16.mxu1 %v2301_v28  ;;  %v2335_v28 = vpack.c.bf16 %v879_v24, %v873_v23  ;;  %v2337_v29 = vpack.c.bf16 %v892_v26, %v886_v25  ;;  %v981_v24 = vld [vmem:[#allocation8 + $0x11c0] sm:$0xff]  ;;  %v987_v25 = vld [vmem:[#allocation8 + $0x11f0] sm:$0xff] }
 0x20c   :  { %1441 = vmatmul.mubr.f32.vlgmr.msra.gmra.mrb[8].mxu0 %v2761_v22  ;;  %v2371_v26 = vpack.c.bf16 %v987_v25, %v981_v24 }
 0x20e   :  { %2304 = vmatpush1.bf16.msra.mxu1 %v2303_v32  ;;  %v904_v32 = vld [vmem:[#allocation8 + $0xf58] sm:$0xff] }
 0x20f   :  { %2306 = vmatprep.subr.bf16.mxu1 %v2305_v33  ;;  %v2339_v33 = vpack.c.bf16 %v891_v20, %v885_v30  ;;  %v2341_v34 = vpack.c.bf16 %v904_v32, %v898_v31 }
 0x212   :  { %2308 = vmatpush1.bf16.msra.mxu1 %v2307_v38  ;;  %v916_v38 = vld [vmem:[#allocation8 + $0xfb8] sm:$0xff] }
 0x213   :  { %2310 = vmatprep.subr.bf16.mxu1 %v2309_v39  ;;  %v2343_v39 = vpack.c.bf16 %v903_v36, %v897_v35  ;;  %v2345_v43 = vpack.c.bf16 %v916_v38, %v910_v37 }
 0x215   :  { %1583 = vmatmul.mubr.f32.vlgmr.msra.gmra.mrb[2].mxu1 %v2746_v40  ;;  %v2323_v40 = vpack.c.bf16 %v843_v4, %v837_v3  ;;  %v945_v4 = vld [vmem:[#allocation8 + $0x10a0] sm:$0xff] }
 0x216   :  { %2312 = vmatpush1.bf16.msra.mxu1 %v2311_v50  ;;  %1653 = vmatprep.mubr.f32.mxu1 %v2763_v27  ;;  %v2325_v27 = vpack.c.bf16 %v856_v6, %v850_v5  ;;  %v928_v50 = vld [vmem:[#allocation8 + $0x1018] sm:$0xff]  ;;  %v951_v5 = vld [vmem:[#allocation8 + $0x10d0] sm:$0xff]  ;;  %v958_v6 = vld [vmem:[#allocation8 + $0x1108] sm:$0xff] }
 0x217   :  { %2314 = vmatprep.subr.bf16.mxu1 %v2313_v51  ;;  %v2347_v51 = vpack.c.bf16 %v915_v47, %v909_v44  ;;  %v2349_v52 = vpack.c.bf16 %v928_v50, %v922_v49 }
 0x21a   :  { %2316 = vmatpush1.bf16.msra.mxu1 %v2315_v58  ;;  %v940_v58 = vld [vmem:[#allocation8 + $0x1078] sm:$0xff] }
 0x21b   :  { %2318 = vmatprep.subr.bf16.mxu1 %v2317_v59  ;;  %v2351_v59 = vpack.c.bf16 %v927_v55, %v921_v53  ;;  %v2353_v60 = vpack.c.bf16 %v940_v58, %v934_v57 }
 0x21e   :  { %2320 = vmatpush1.bf16.msra.mxu1 %v2319_v2  ;;  %v952_v2 = vld [vmem:[#allocation8 + $0x10d8] sm:$0xff] }
 0x21f   :  { %v2779_v7 = vpop.f32.mrb[6].mxu0  ;;  %2322 = vmatprep.subr.bf16.mxu1 %v2321_v42  ;;  %v2355_v42 = vpack.c.bf16 %v939_v11, %v933_v61  ;;  %v2357_v3 = vpack.c.bf16 %v952_v2, %v946_v63 }
 0x220   :  { %v2781_v9 = vpop.f32.mrb[7].mxu0 }
 0x222   :  { %2324 = vmatpush1.bf16.msra.mxu1 %v2323_v40  ;;  %v964_v40 = vld [vmem:[#allocation8 + $0x1138] sm:$0xff] }
 0x223   :  { %2326 = vmatprep.subr.bf16.mxu1 %v2325_v27  ;;  %v2359_v27 = vpack.c.bf16 %v951_v5, %v945_v4  ;;  %v2361_v8 = vpack.c.bf16 %v964_v40, %v958_v6 }
 0x226   :  { %2328 = vmatpush1.bf16.msra.mxu1 %v2327_v13  ;;  %v976_v13 = vld [vmem:[#allocation8 + $0x1198] sm:$0xff] }
 0x227   :  { %2330 = vmatprep.subr.bf16.mxu1 %v2329_v14  ;;  %v2363_v14 = vpack.c.bf16 %v963_v10, %v957_v0  ;;  %v2365_v16 = vpack.c.bf16 %v976_v13, %v970_v12 }
 0x22a   :  { %2332 = vmatpush1.bf16.msra.mxu1 %v2331_v19  ;;  %v988_v19 = vld [vmem:[#allocation8 + $0x11f8] sm:$0xff] }
 0x22b   :  { %2334 = vmatprep.subr.bf16.mxu1 %v2333_v21  ;;  %v2367_v21 = vpack.c.bf16 %v975_v18, %v969_v17  ;;  %v2369_v23 = vpack.c.bf16 %v988_v19, %v982_v15 }
 0x22e   :  { %2336 = vmatpush1.bf16.msra.mxu1 %v2335_v28  ;;  %v989_v28 = vld [vmem:[#allocation10] sm:$0x3f] }
 0x22f   :  { %2338 = vmatprep.subr.bf16.mxu1 %v2337_v29  ;;  %v994_v29 = vrot.slane %v989_v28, %v115_v46  ;;  %v998_v30 = vrot.slane %v989_v28, %v119_v48 }
 0x231   :  { %v1088_v20 = vadd.f32 %v2779_v7, %v994_v29  ;;  %v1090_v31 = vadd.f32 %v2781_v9, %v998_v30 }
 0x232   :  { %2340 = vmatpush1.bf16.msra.mxu1 %v2339_v33 }
 0x233   :  { %2342 = vmatprep.subr.bf16.mxu1 %v2341_v34 }
 0x236   :  { %2344 = vmatpush1.bf16.msra.mxu1 %v2343_v39 }
 0x237   :  { %2346 = vmatprep.subr.bf16.mxu1 %v2345_v43 }
 0x23a   :  { %2348 = vmatpush1.bf16.msra.mxu1 %v2347_v51 }
 0x23b   :  { %2350 = vmatprep.subr.bf16.mxu1 %v2349_v52 }
 0x23e   :  { %2352 = vmatpush1.bf16.msra.mxu1 %v2351_v59 }
 0x23f   :  { %2354 = vmatprep.subr.bf16.mxu1 %v2353_v60 }
 0x242   :  { %2356 = vmatpush1.bf16.msra.mxu1 %v2355_v42 }
 0x243   :  { %2358 = vmatprep.subr.bf16.mxu1 %v2357_v3 }
 0x246   :  { %2360 = vmatpush1.bf16.msra.mxu1 %v2359_v27 }
 0x247   :  { %2362 = vmatprep.subr.bf16.mxu1 %v2361_v8 }
 0x24a   :  { %2364 = vmatpush1.bf16.msra.mxu1 %v2363_v14 }
 0x24b   :  { %2366 = vmatprep.subr.bf16.mxu1 %v2365_v16 }
 0x24e   :  { %2368 = vmatpush1.bf16.msra.mxu1 %v2367_v21 }
 0x24f   :  { %2370 = vmatprep.subr.bf16.mxu1 %v2369_v23 }
 0x252   :  { %2372 = vmatpush1.bf16.msra.mxu1 %v2371_v26 }
 0x255   :  { %1654 = vmatmul.mubr.f32.vlgmr.msra.gmra.mrb[2].mxu1 %v2761_v22 }
 0x267   :  { %v1229_v32 = vpop.f32.mrb[0].mxu1 }
 0x268   :  { %v2374_v33 = vadd.f32 %v1229_v32, %v1088_v20  ;;  %v1231_v34 = vpop.f32.mrb[1].mxu1 }
 0x269   :  { %v2376_v35 = vadd.f32 %v1231_v34, %v1090_v31 }
 0x26a   :  { %v1766_v36 = vmul.f32 -1.442695, %v2374_v33 }
 0x26b   :  { %v1767_v37 = vmul.f32 -1.442695, %v2376_v35 }
 0x26c   :  { %2414 = vpow2.f32 %v1766_v36 }
 0x26d   :  { %2416 = vpow2.f32 %v1767_v37 }
 0x276   :  { %v2415_v22 = vpop.eup %2414 }
 0x277   :  { %v2417_v38 = vpop.eup %2416  ;;  %v1678_v39 = vadd.f32 1.0, %v2415_v22 }
 0x278   :  { %v1679_v43 = vadd.f32 1.0, %v2417_v38 }
 0x279   :  { %2418 = vrcp.f32 %v1678_v39 }
 0x27a   :  { %2420 = vrcp.f32 %v1679_v43 }
 0x283   :  { %v2419_v46 = vpop.eup %2418 }
 0x284   :  { %v2421_v48 = vpop.eup %2420 }
 0x285   :  { %v1702_v44 = vcombine.low %v2419_v46, %v2421_v48 }
 0x286   :  { %2559 = shalt.err (!%p2556_p2)
}
 0x287   :  { %s2560_s8 = scalar_lea.hbm %s2829_s5, 192 }
 0x288   :  { %p2561_p3 = scmp.ne.s32.totalorder %s2829_s5, %s2560_s8  ;;  %p2564_p4 = scmp.lt.u32.totalorder %s2560_s8, %s2829_s5 }
 0x28a   :  { %p2566_p5 = pnand %p2564_p4, %p2561_p3 }
 0x28c   :  { %2569 = shalt.err (!%p2566_p5)
}
 0x28d   :  { %1740 = dma.vmem_to_hbm [thread:$0]  %s1738_s30, 192, %s2829_s5, [#allocation4]   ;;  %v1002_v7 = vrot.slane %v989_v28, %v123_v54  ;;  %v1006_v9 = vrot.slane %v989_v28, %v127_v56  ;;  %v1710_v11 = vrot.slane %v1702_v44, %v2749_v41  ;;  %v1010_v2 = vrot.slane %v989_v28, %v131_v62 }
 0x28e   :  { %v1014_v42 = vrot.slane %v989_v28, %v135_v1  ;;  %s2612_s5 = smov [#allocation12]  }
 0x28f   :  { %s1747_s17 = sshll.u32 %s2612_s5, 4  ;;  %s1748_s17 = int_to_ptr.vmem [resolvable:$true] %s1747_s17 }
 0x290   :  { %s2570_s18 = scalar_lea.vmem %s1748_s17, 192  ;;  %p2575_p7 = scmp.lt.s32.totalorder %s1748_s17, %s1748_s17 }
 0x291   :  { %p2571_p6 = scmp.ne.s32.totalorder %s1748_s17, %s2570_s18  ;;  %p2576_p8 = scmp.lt.s32.totalorder %s2570_s18, %s2570_s18 }
 0x293   :  { %p2577_p9 = por %p2576_p8, %p2575_p7 }
 0x295   :  { %p2578_p10 = pnand %p2577_p9, %p2571_p6 }
 0x2df   :  { %v1442_v47 = vpop.f32.mrb[8].mxu0 }
 0x2e0   :  { %v2377_v49 = vadd.f32 %v1442_v47, %v1002_v7  ;;  %v1444_v50 = vpop.f32.mrb[9].mxu0 }
 0x2e1   :  { %v2378_v51 = vadd.f32 %v1444_v50, %v1006_v9 }
 0x2e2   :  { %v1768_v52 = vmul.f32 -1.442695, %v2377_v49 }
 0x2e3   :  { %v1769_v53 = vmul.f32 -1.442695, %v2378_v51 }
 0x2e4   :  { %2422 = vpow2.f32 %v1768_v52 }
 0x2e5   :  { %2424 = vpow2.f32 %v1769_v53 }
 0x2ee   :  { %v2423_v55 = vpop.eup %2422 }
 0x2ef   :  { %v2425_v57 = vpop.eup %2424  ;;  %v1680_v58 = vadd.f32 1.0, %v2423_v55 }
 0x2f0   :  { %v1681_v59 = vadd.f32 1.0, %v2425_v57 }
 0x2f1   :  { %2426 = vrcp.f32 %v1680_v58 }
 0x2f2   :  { %2428 = vrcp.f32 %v1681_v59 }
 0x2fb   :  { %v2427_v60 = vpop.eup %2426 }
 0x2fc   :  { %v2429_v61 = vpop.eup %2428 }
 0x2fd   :  { %v1703_v54 = vcombine.low %v2427_v60, %v2429_v61 }
 0x2ff   :  { %v1717_v56 = vrot.slane %v1703_v54, %v2749_v41 }
 0x301   :  { %v1718_v63 = vcombine.low %v1710_v11, %v1717_v56 }
 0x303   :  { %1729 = vst [vmem:[#allocation12] sm:$0xff] %v1718_v63 }
 0x328   :  { %v1655_v3 = vpop.f32.mrb[2].mxu1 }
 0x329   :  { %v2379_v4 = vadd.f32 %v1655_v3, %v1010_v2  ;;  %v1657_v5 = vpop.f32.mrb[3].mxu1 }
 0x32a   :  { %v2380_v6 = vadd.f32 %v1657_v5, %v1014_v42 }
 0x32b   :  { %v1770_v40 = vmul.f32 -1.442695, %v2379_v4 }
 0x32c   :  { %v1771_v27 = vmul.f32 -1.442695, %v2380_v6 }
 0x32d   :  { %2430 = vpow2.f32 %v1770_v40 }
 0x32e   :  { %2432 = vpow2.f32 %v1771_v27 }
 0x337   :  { %v2431_v8 = vpop.eup %2430 }
 0x338   :  { %v2433_v0 = vpop.eup %2432  ;;  %v1682_v10 = vadd.f32 1.0, %v2431_v8 }
 0x339   :  { %v1683_v41 = vadd.f32 1.0, %v2433_v0 }
 0x33a   :  { %2434 = vrcp.f32 %v1682_v10 }
 0x33b   :  { %2436 = vrcp.f32 %v1683_v41 }
 0x344   :  { %v2435_v62 = vpop.eup %2434 }
 0x345   :  { %v2437_v12 = vpop.eup %2436 }
 0x346   :  { %v1719_v45 = vcombine.low %v2435_v62, %v2437_v12 }
 0x348   :  { %1772 = vst.sshfl [vmem:[#allocation12 + $0x8] sm:$0x33 pattern:$0x76325410] %v1719_v45 }
 0x349   :  { %2581 = shalt.err (!%p2578_p10)
}
 0x34a   :  { %s2582_s0 = scalar_lea.hbm %s2830_s6, 192 }
 0x34b   :  { %p2583_p11 = scmp.ne.s32.totalorder %s2830_s6, %s2582_s0  ;;  %p2586_p12 = scmp.lt.u32.totalorder %s2582_s0, %s2830_s6 }
 0x34d   :  { %p2588_p13 = pnand %p2586_p12, %p2583_p11 }
 0x34f   :  { %2591 = shalt.err (!%p2588_p13)
}
 0x350   :  { %1750 = dma.vmem_to_hbm [thread:$0]  %s1748_s17, 192, %s2830_s6, [#allocation13]  }
 0x351   :  { %2598 = dma.done.wait [#allocation4], 192  }
 0x352   :  { %2599 = vsyncadd [#allocation4], 4294967104 }
 0x353   :  { %2600 = dma.done.wait [#allocation13], 192  }
 0x354   :  { %2601 = vsyncadd [#allocation13], 4294967104 }
 0x355   :  { %1757 = vsyncpa [#allocation3], 1 }
 0x356   :  { %1758 = vsyncpa [#allocation6], 1 }
 0x357   :  { %1759 = vsyncpa [#allocation9], 1 }
 0x358   :  { %1760 = vsyncpa [#allocation4], 1 }
 0x359   :  { %1761 = vsyncpa [#allocation13], 1 }

</bundles_post_ra>
